<compile_context>
chip_gen: v7x
topology: tpu7x:2x2x1
jax: 0.10.0
libtpu: 0.0.40
codegen_flags: <defaults>
</compile_context>

<pallas_src>
import jax
import jax.numpy as jnp
from jax import lax
from jax.experimental import pallas as pl
from jax.experimental.pallas import tpu as pltpu

LANE = 128  # TPU lane width; hidden dim is padded to a multiple of this.


def gru_seq_kernel(ids_ref,     # (T,) int32, SMEM (scalar prefetch)
                   p_ref,       # (V, 3*Hp) f32, VMEM: emb @ W_ih^T + b_ih  [r|z|n]
                   wh_ref,      # (Hp, 3*Hp) f32, VMEM: W_hh^T fused        [r|z|n]
                   bh_ref,      # (1, 3*Hp) f32, VMEM: b_hh fused           [r|z|n]
                   h0_ref,      # (1, Hp) f32, initial hidden (zero-padded)
                   out_ref):    # (T, Hp) f32, all per-step GRU outputs (resident)
    Hp = h0_ref.shape[1]
    T = out_ref.shape[0]
    V = p_ref.shape[0]

    # Hoist the resident recurrent weight / bias loads out of the time loop.
    wh = wh_ref[...]
    bh = bh_ref[...]

    def step(t, h):
        # Embedding + input projection: one row gather from the precomputed
        # projected table (clamped id -> no silent OOB VMEM read).
        tok = jnp.clip(ids_ref[t], 0, V - 1)
        xp = p_ref[pl.ds(tok, 1), :]                                # (1, 3*Hp)

        # Serial-critical-path matmul: h @ W_h -> [h_r | h_z | h_n]
        gh = jnp.dot(h, wh, preferred_element_type=jnp.float32) + bh

        # Gate math; each slice is a full 128-lane block (no masked ops).
        r = jax.nn.sigmoid(xp[:, 0 * Hp:1 * Hp] + gh[:, 0 * Hp:1 * Hp])
        z = jax.nn.sigmoid(xp[:, 1 * Hp:2 * Hp] + gh[:, 1 * Hp:2 * Hp])
        n = jnp.tanh(xp[:, 2 * Hp:3 * Hp] + r * gh[:, 2 * Hp:3 * Hp])
        h_new = (1.0 - z) * n + z * h

        out_ref[pl.ds(t, 1), :] = h_new                             # row store
        return h_new

    # Strictly sequential recurrence; unrolled so the LLO scheduler sees it.
    lax.fori_loop(0, T, step, h0_ref[...], unroll=True)


def pack_params(emb, w_ih, w_hh, b_ih, b_hh, lane=LANE):
    """Pack torch-layout GRU params into the hoisted, lane-padded layout.

    Returns:
      p   (V, 3*Hp): precomputed input projection  emb @ W_ih^T + b_ih
                     in gate blocks [ i_r | i_z | i_n ], each Hp wide.
      w_h (Hp, 3*Hp): recurrent weight, gate blocks [ h_r | h_z | h_n ].
      b_h (1, 3*Hp):  recurrent bias,   gate blocks [ h_r | h_z | h_n ].
    """
    V, H = emb.shape
    Hp = ((H + lane - 1) // lane) * lane

    wir, wiz, win = w_ih[:H], w_ih[H:2 * H], w_ih[2 * H:]
    whr, whz, whn = w_hh[:H], w_hh[H:2 * H], w_hh[2 * H:]
    bir, biz, bin_ = b_ih[:H], b_ih[H:2 * H], b_ih[2 * H:]
    bhr, bhz, bhn = b_hh[:H], b_hh[H:2 * H], b_hh[2 * H:]

    emb = emb.astype(jnp.float32)

    p = jnp.zeros((V, 3 * Hp), jnp.float32)
    p = p.at[:, 0 * Hp:0 * Hp + H].set(emb @ wir.T + bir)
    p = p.at[:, 1 * Hp:1 * Hp + H].set(emb @ wiz.T + biz)
    p = p.at[:, 2 * Hp:2 * Hp + H].set(emb @ win.T + bin_)

    w_h = jnp.zeros((Hp, 3 * Hp), jnp.float32)
    w_h = w_h.at[:H, 0 * Hp:0 * Hp + H].set(whr.T)
    w_h = w_h.at[:H, 1 * Hp:1 * Hp + H].set(whz.T)
    w_h = w_h.at[:H, 2 * Hp:2 * Hp + H].set(whn.T)

    b_h = jnp.zeros((1, 3 * Hp), jnp.float32)
    b_h = b_h.at[0, 0 * Hp:0 * Hp + H].set(bhr)
    b_h = b_h.at[0, 1 * Hp:1 * Hp + H].set(bhz)
    b_h = b_h.at[0, 2 * Hp:2 * Hp + H].set(bhn)

    return p, w_h, b_h


def encoder_rnn_sequence(token_ids, hidden0, packed, hidden_size):
    """Run the encoder GRU over a whole token sequence in ONE kernel invocation.

    token_ids: (T,) int32; hidden0: (1,1,H) f32.
    Returns (outputs (T,1,H), final hidden (1,1,H))."""
    p, w_h, b_h = packed
    V = p.shape[0]
    Hp = p.shape[1] // 3
    H = hidden_size
    T = int(token_ids.shape[0])

    # Zero-padded initial hidden (padding lanes MUST be 0; see kernel comment).
    h0 = jnp.zeros((1, Hp), jnp.float32).at[:, :H].set(
        hidden0.reshape(1, H).astype(jnp.float32))

    out = pl.pallas_call(
        gru_seq_kernel,
        out_shape=jax.ShapeDtypeStruct((T, Hp), jnp.float32),
        grid_spec=pltpu.PrefetchScalarGridSpec(
            num_scalar_prefetch=1,                 # token ids -> SMEM
            grid=(1,),                             # single invocation
            in_specs=[
                pl.BlockSpec((V, 3 * Hp), lambda i, ids: (0, 0)),    # P table
                pl.BlockSpec((Hp, 3 * Hp), lambda i, ids: (0, 0)),   # W_h
                pl.BlockSpec((1, 3 * Hp), lambda i, ids: (0, 0)),    # b_h
                pl.BlockSpec((1, Hp), lambda i, ids: (0, 0)),        # h0
            ],
            out_specs=pl.BlockSpec((T, Hp), lambda i, ids: (0, 0)),  # resident
        ),
        compiler_params=pltpu.CompilerParams(
            dimension_semantics=("arbitrary",)),
    )(token_ids.astype(jnp.int32), p, w_h, b_h, h0)

    outputs = out[:, :H].reshape(T, 1, H)          # strip lane padding
    hidden = outputs[T - 1].reshape(1, 1, H)
    return outputs, hidden


def encoder_rnn_forward(token_id, hidden, packed, hidden_size):
    """Single-step forward matching EncoderRNN.forward(input, hidden)."""
    outputs, hidden_out = encoder_rnn_sequence(
        jnp.reshape(token_id, (-1,))[:1], hidden, packed, hidden_size)
    return outputs.reshape(1, 1, hidden_size), hidden_out


def make_params(key, input_size, hidden_size):
    """Deterministic synthetic torch-layout parameters."""
    H = hidden_size
    k_emb, k_wih, k_whh, k_bih, k_bhh = jax.random.split(key, 5)
    bound = 1.0 / jnp.sqrt(jnp.float32(H))
    emb = jax.random.normal(k_emb, (input_size, H), jnp.float32)
    w_ih = jax.random.uniform(k_wih, (3 * H, H), jnp.float32, -bound, bound)
    w_hh = jax.random.uniform(k_whh, (3 * H, H), jnp.float32, -bound, bound)
    b_ih = jax.random.uniform(k_bih, (3 * H,), jnp.float32, -bound, bound)
    b_hh = jax.random.uniform(k_bhh, (3 * H,), jnp.float32, -bound, bound)
    return emb, w_ih, w_hh, b_ih, b_hh


def reference_sequence(token_ids, hidden0, raw_params):
    """Pure-JAX torch.nn.GRU (single layer) reference, unpadded weights."""
    emb, w_ih, w_hh, b_ih, b_hh = raw_params
    H = emb.shape[1]
    h = hidden0.reshape(1, H).astype(jnp.float32)
    outs = []
    for t in range(int(token_ids.shape[0])):
        x = emb[token_ids[t]].reshape(1, H)
        gi = jnp.dot(x, w_ih.T) + b_ih
        gh = jnp.dot(h, w_hh.T) + b_hh
        i_r, i_z, i_n = gi[:, :H], gi[:, H:2 * H], gi[:, 2 * H:]
        h_r, h_z, h_n = gh[:, :H], gh[:, H:2 * H], gh[:, 2 * H:]
        r = jax.nn.sigmoid(i_r + h_r)
        z = jax.nn.sigmoid(i_z + h_z)
        n = jnp.tanh(i_n + r * h_n)
        h = (1.0 - z) * n + z * h
        outs.append(h)
    return jnp.stack(outs, axis=0), h.reshape(1, 1, H)


if __name__ == "__main__":
    INPUT_SIZE = 64     # vocabulary size
    HIDDEN = 32         # hidden size
    SEQ_LEN = 8         # encoder sequence length

    key = jax.random.PRNGKey(0)
    raw = make_params(key, INPUT_SIZE, HIDDEN)
    packed = pack_params(*raw)

    tokens = jax.random.randint(jax.random.PRNGKey(1), (SEQ_LEN,), 0,
                                INPUT_SIZE, dtype=jnp.int32)
    # NOTE: the original initHidden() returns hidden_size-4 features, which is
    # inconsistent with its own forward(); we use the full (1,1,H) hidden.
    hidden0 = jnp.zeros((1, 1, HIDDEN), dtype=jnp.float32)

    # Whole sequence: one pallas_call, one in-kernel unrolled recurrence.
    outs, hid = encoder_rnn_sequence(tokens, hidden0, packed, HIDDEN)
    outs = jax.block_until_ready(outs)
    hid = jax.block_until_ready(hid)

    ref_outs, ref_hid = reference_sequence(tokens, hidden0, raw)
    assert outs.shape == (SEQ_LEN, 1, HIDDEN) and hid.shape == (1, 1, HIDDEN)
    # Tolerance absorbs MXU f32-pass / padded-K rounding differences between
    # the hoisted-projection kernel and the reference's per-step matmuls.
    assert jnp.allclose(outs, ref_outs, rtol=1e-3, atol=1e-2), "seq output mismatch"
    assert jnp.allclose(hid, ref_hid, rtol=1e-3, atol=1e-2), "seq hidden mismatch"

    # Single-step forward: semantics of EncoderRNN.forward(input, hidden).
    tok1 = jnp.array([7], dtype=jnp.int32)
    out1, hid1 = encoder_rnn_forward(tok1, hidden0, packed, HIDDEN)
    out1 = jax.block_until_ready(out1)
    hid1 = jax.block_until_ready(hid1)
    ref_out1, ref_hid1 = reference_sequence(tok1, hidden0, raw)
    assert out1.shape == (1, 1, HIDDEN) and hid1.shape == (1, 1, HIDDEN)
    assert jnp.allclose(out1, ref_out1.reshape(1, 1, HIDDEN), rtol=1e-3, atol=1e-2)
    assert jnp.allclose(hid1, ref_hid1, rtol=1e-3, atol=1e-2)

    print("KERNEL_OK")
</pallas_src>

<mosaic_0001>
module attributes {stable_mosaic.version = 11 : i64} {
  func.func @gru_seq_kernel(%arg0: i32, %arg1: memref<8xi32, #tpu.memory_space<smem>>, %arg2: memref<64x384xf32, #tpu.memory_space<vmem>>, %arg3: memref<128x384xf32, #tpu.memory_space<vmem>>, %arg4: memref<1x384xf32, #tpu.memory_space<vmem>>, %arg5: memref<1x128xf32, #tpu.memory_space<vmem>>, %arg6: memref<8x128xf32, #tpu.memory_space<vmem>>) attributes {dimension_semantics = [#tpu.dimension_semantics<arbitrary>], iteration_bounds = array<i64: 1>, scalar_prefetch = 1 : i64, scratch_operands = 0 : i64, tpu.core_type = #tpu.core_type<tc>, window_params = [{pipeline_mode = #tpu.pipeline_mode<synchronous>, transform_indices = @transform_0, window_bounds = array<i64: 64, 384>}, {pipeline_mode = #tpu.pipeline_mode<synchronous>, transform_indices = @transform_1, window_bounds = array<i64: 128, 384>}, {pipeline_mode = #tpu.pipeline_mode<synchronous>, transform_indices = @transform_2, window_bounds = array<i64: 1, 384>}, {pipeline_mode = #tpu.pipeline_mode<synchronous>, transform_indices = @transform_3, window_bounds = array<i64: 1, 128>}, {pipeline_mode = #tpu.pipeline_mode<synchronous>, transform_indices = @transform_4, window_bounds = array<i64: 8, 128>}]} {
    %c0 = arith.constant 0 : index
    %c0_0 = arith.constant 0 : index
    %0 = vector.load %arg3[%c0, %c0_0] : memref<128x384xf32, #tpu.memory_space<vmem>>, vector<128x384xf32>
    %c0_1 = arith.constant 0 : index
    %c0_2 = arith.constant 0 : index
    %1 = vector.load %arg4[%c0_1, %c0_2] : memref<1x384xf32, #tpu.memory_space<vmem>>, vector<1x384xf32>
    %c0_3 = arith.constant 0 : index
    %c0_4 = arith.constant 0 : index
    %2 = vector.load %arg5[%c0_3, %c0_4] : memref<1x128xf32, #tpu.memory_space<vmem>>, vector<1x128xf32>
    %c0_i32 = arith.constant 0 : i32
    %3 = arith.index_cast %c0_i32 : i32 to index
    %4 = memref.load %arg1[%3] : memref<8xi32, #tpu.memory_space<smem>>
    %c0_i32_5 = arith.constant 0 : i32
    %c63_i32 = arith.constant 63 : i32
    %5 = arith.maxsi %c0_i32_5, %4 : i32
    %6 = arith.minsi %c63_i32, %5 : i32
    %7 = arith.index_cast %6 : i32 to index
    %c0_6 = arith.constant 0 : index
    %8 = vector.load %arg2[%7, %c0_6] : memref<64x384xf32, #tpu.memory_space<vmem>>, vector<1x384xf32>
    %cst = arith.constant dense<0.000000e+00> : vector<1x384xf32>
    %9 = tpu.matmul %2, %0, %cst {dimension_numbers = #tpu.dot_dimension_numbers<[1], [0], [0], [1], [0, 0, 1, 1], [], []>} : vector<1x128xf32>, vector<128x384xf32>, vector<1x384xf32> -> vector<1x384xf32>
    %10 = arith.addf %9, %1 : vector<1x384xf32>
    %11 = vector.extract_strided_slice %8 {offsets = [0, 0], sizes = [1, 128], strides = [1, 1]} : vector<1x384xf32> to vector<1x128xf32>
    %12 = vector.extract_strided_slice %10 {offsets = [0, 0], sizes = [1, 128], strides = [1, 1]} : vector<1x384xf32> to vector<1x128xf32>
    %13 = arith.addf %11, %12 : vector<1x128xf32>
    %14 = arith.negf %13 : vector<1x128xf32>
    %15 = math.exp %14 : vector<1x128xf32>
    %cst_7 = arith.constant 1.000000e+00 : f32
    %16 = vector.broadcast %cst_7 : f32 to vector<1x128xf32>
    %17 = arith.addf %16, %15 : vector<1x128xf32>
    %18 = arith.divf %16, %17 : vector<1x128xf32>
    %19 = vector.extract_strided_slice %8 {offsets = [0, 128], sizes = [1, 128], strides = [1, 1]} : vector<1x384xf32> to vector<1x128xf32>
    %20 = vector.extract_strided_slice %10 {offsets = [0, 128], sizes = [1, 128], strides = [1, 1]} : vector<1x384xf32> to vector<1x128xf32>
    %21 = arith.addf %19, %20 : vector<1x128xf32>
    %22 = arith.negf %21 : vector<1x128xf32>
    %23 = math.exp %22 : vector<1x128xf32>
    %cst_8 = arith.constant 1.000000e+00 : f32
    %24 = vector.broadcast %cst_8 : f32 to vector<1x128xf32>
    %25 = arith.addf %24, %23 : vector<1x128xf32>
    %26 = arith.divf %24, %25 : vector<1x128xf32>
    %27 = vector.extract_strided_slice %8 {offsets = [0, 256], sizes = [1, 128], strides = [1, 1]} : vector<1x384xf32> to vector<1x128xf32>
    %28 = vector.extract_strided_slice %10 {offsets = [0, 256], sizes = [1, 128], strides = [1, 1]} : vector<1x384xf32> to vector<1x128xf32>
    %29 = arith.mulf %18, %28 : vector<1x128xf32>
    %30 = arith.addf %27, %29 : vector<1x128xf32>
    %31 = math.tanh %30 : vector<1x128xf32>
    %cst_9 = arith.constant 1.000000e+00 : f32
    %32 = vector.broadcast %cst_9 : f32 to vector<1x128xf32>
    %33 = arith.subf %32, %26 : vector<1x128xf32>
    %34 = arith.mulf %33, %31 : vector<1x128xf32>
    %35 = arith.mulf %26, %2 : vector<1x128xf32>
    %36 = arith.addf %34, %35 : vector<1x128xf32>
    %37 = arith.index_cast %c0_i32 : i32 to index
    %c0_10 = arith.constant 0 : index
    %38 = vector.load %arg6[%37, %c0_10] : memref<8x128xf32, #tpu.memory_space<vmem>>, vector<1x128xf32>
    tpu.vector_store %arg6[%37, %c0_10], %36 {strides = array<i32>} : memref<8x128xf32, #tpu.memory_space<vmem>>, vector<1x128xf32>,
    %c1_i32 = arith.constant 1 : i32
    %39 = arith.index_cast %c1_i32 : i32 to index
    %40 = memref.load %arg1[%39] : memref<8xi32, #tpu.memory_space<smem>>
    %c0_i32_11 = arith.constant 0 : i32
    %c63_i32_12 = arith.constant 63 : i32
    %41 = arith.maxsi %c0_i32_11, %40 : i32
    %42 = arith.minsi %c63_i32_12, %41 : i32
    %43 = arith.index_cast %42 : i32 to index
    %c0_13 = arith.constant 0 : index
    %44 = vector.load %arg2[%43, %c0_13] : memref<64x384xf32, #tpu.memory_space<vmem>>, vector<1x384xf32>
    %cst_14 = arith.constant dense<0.000000e+00> : vector<1x384xf32>
    %45 = tpu.matmul %36, %0, %cst_14 {dimension_numbers = #tpu.dot_dimension_numbers<[1], [0], [0], [1], [0, 0, 1, 1], [], []>} : vector<1x128xf32>, vector<128x384xf32>, vector<1x384xf32> -> vector<1x384xf32>
    %46 = arith.addf %45, %1 : vector<1x384xf32>
    %47 = vector.extract_strided_slice %44 {offsets = [0, 0], sizes = [1, 128], strides = [1, 1]} : vector<1x384xf32> to vector<1x128xf32>
    %48 = vector.extract_strided_slice %46 {offsets = [0, 0], sizes = [1, 128], strides = [1, 1]} : vector<1x384xf32> to vector<1x128xf32>
    %49 = arith.addf %47, %48 : vector<1x128xf32>
    %50 = arith.negf %49 : vector<1x128xf32>
    %51 = math.exp %50 : vector<1x128xf32>
    %cst_15 = arith.constant 1.000000e+00 : f32
    %52 = vector.broadcast %cst_15 : f32 to vector<1x128xf32>
    %53 = arith.addf %52, %51 : vector<1x128xf32>
    %54 = arith.divf %52, %53 : vector<1x128xf32>
    %55 = vector.extract_strided_slice %44 {offsets = [0, 128], sizes = [1, 128], strides = [1, 1]} : vector<1x384xf32> to vector<1x128xf32>
    %56 = vector.extract_strided_slice %46 {offsets = [0, 128], sizes = [1, 128], strides = [1, 1]} : vector<1x384xf32> to vector<1x128xf32>
    %57 = arith.addf %55, %56 : vector<1x128xf32>
    %58 = arith.negf %57 : vector<1x128xf32>
    %59 = math.exp %58 : vector<1x128xf32>
    %cst_16 = arith.constant 1.000000e+00 : f32
    %60 = vector.broadcast %cst_16 : f32 to vector<1x128xf32>
    %61 = arith.addf %60, %59 : vector<1x128xf32>
    %62 = arith.divf %60, %61 : vector<1x128xf32>
    %63 = vector.extract_strided_slice %44 {offsets = [0, 256], sizes = [1, 128], strides = [1, 1]} : vector<1x384xf32> to vector<1x128xf32>
    %64 = vector.extract_strided_slice %46 {offsets = [0, 256], sizes = [1, 128], strides = [1, 1]} : vector<1x384xf32> to vector<1x128xf32>
    %65 = arith.mulf %54, %64 : vector<1x128xf32>
    %66 = arith.addf %63, %65 : vector<1x128xf32>
    %67 = math.tanh %66 : vector<1x128xf32>
    %cst_17 = arith.constant 1.000000e+00 : f32
    %68 = vector.broadcast %cst_17 : f32 to vector<1x128xf32>
    %69 = arith.subf %68, %62 : vector<1x128xf32>
    %70 = arith.mulf %69, %67 : vector<1x128xf32>
    %71 = arith.mulf %62, %36 : vector<1x128xf32>
    %72 = arith.addf %70, %71 : vector<1x128xf32>
    %73 = arith.index_cast %c1_i32 : i32 to index
    %c0_18 = arith.constant 0 : index
    %74 = vector.load %arg6[%73, %c0_18] : memref<8x128xf32, #tpu.memory_space<vmem>>, vector<1x128xf32>
    tpu.vector_store %arg6[%73, %c0_18], %72 {strides = array<i32>} : memref<8x128xf32, #tpu.memory_space<vmem>>, vector<1x128xf32>,
    %c2_i32 = arith.constant 2 : i32
    %75 = arith.index_cast %c2_i32 : i32 to index
    %76 = memref.load %arg1[%75] : memref<8xi32, #tpu.memory_space<smem>>
    %c0_i32_19 = arith.constant 0 : i32
    %c63_i32_20 = arith.constant 63 : i32
    %77 = arith.maxsi %c0_i32_19, %76 : i32
    %78 = arith.minsi %c63_i32_20, %77 : i32
    %79 = arith.index_cast %78 : i32 to index
    %c0_21 = arith.constant 0 : index
    %80 = vector.load %arg2[%79, %c0_21] : memref<64x384xf32, #tpu.memory_space<vmem>>, vector<1x384xf32>
    %cst_22 = arith.constant dense<0.000000e+00> : vector<1x384xf32>
    %81 = tpu.matmul %72, %0, %cst_22 {dimension_numbers = #tpu.dot_dimension_numbers<[1], [0], [0], [1], [0, 0, 1, 1], [], []>} : vector<1x128xf32>, vector<128x384xf32>, vector<1x384xf32> -> vector<1x384xf32>
    %82 = arith.addf %81, %1 : vector<1x384xf32>
    %83 = vector.extract_strided_slice %80 {offsets = [0, 0], sizes = [1, 128], strides = [1, 1]} : vector<1x384xf32> to vector<1x128xf32>
    %84 = vector.extract_strided_slice %82 {offsets = [0, 0], sizes = [1, 128], strides = [1, 1]} : vector<1x384xf32> to vector<1x128xf32>
    %85 = arith.addf %83, %84 : vector<1x128xf32>
    %86 = arith.negf %85 : vector<1x128xf32>
    %87 = math.exp %86 : vector<1x128xf32>
    %cst_23 = arith.constant 1.000000e+00 : f32
    %88 = vector.broadcast %cst_23 : f32 to vector<1x128xf32>
    %89 = arith.addf %88, %87 : vector<1x128xf32>
    %90 = arith.divf %88, %89 : vector<1x128xf32>
    %91 = vector.extract_strided_slice %80 {offsets = [0, 128], sizes = [1, 128], strides = [1, 1]} : vector<1x384xf32> to vector<1x128xf32>
    %92 = vector.extract_strided_slice %82 {offsets = [0, 128], sizes = [1, 128], strides = [1, 1]} : vector<1x384xf32> to vector<1x128xf32>
    %93 = arith.addf %91, %92 : vector<1x128xf32>
    %94 = arith.negf %93 : vector<1x128xf32>
    %95 = math.exp %94 : vector<1x128xf32>
    %cst_24 = arith.constant 1.000000e+00 : f32
    %96 = vector.broadcast %cst_24 : f32 to vector<1x128xf32>
    %97 = arith.addf %96, %95 : vector<1x128xf32>
    %98 = arith.divf %96, %97 : vector<1x128xf32>
    %99 = vector.extract_strided_slice %80 {offsets = [0, 256], sizes = [1, 128], strides = [1, 1]} : vector<1x384xf32> to vector<1x128xf32>
    %100 = vector.extract_strided_slice %82 {offsets = [0, 256], sizes = [1, 128], strides = [1, 1]} : vector<1x384xf32> to vector<1x128xf32>
    %101 = arith.mulf %90, %100 : vector<1x128xf32>
    %102 = arith.addf %99, %101 : vector<1x128xf32>
    %103 = math.tanh %102 : vector<1x128xf32>
    %cst_25 = arith.constant 1.000000e+00 : f32
    %104 = vector.broadcast %cst_25 : f32 to vector<1x128xf32>
    %105 = arith.subf %104, %98 : vector<1x128xf32>
    %106 = arith.mulf %105, %103 : vector<1x128xf32>
    %107 = arith.mulf %98, %72 : vector<1x128xf32>
    %108 = arith.addf %106, %107 : vector<1x128xf32>
    %109 = arith.index_cast %c2_i32 : i32 to index
    %c0_26 = arith.constant 0 : index
    %110 = vector.load %arg6[%109, %c0_26] : memref<8x128xf32, #tpu.memory_space<vmem>>, vector<1x128xf32>
    tpu.vector_store %arg6[%109, %c0_26], %108 {strides = array<i32>} : memref<8x128xf32, #tpu.memory_space<vmem>>, vector<1x128xf32>,
    %c3_i32 = arith.constant 3 : i32
    %111 = arith.index_cast %c3_i32 : i32 to index
    %112 = memref.load %arg1[%111] : memref<8xi32, #tpu.memory_space<smem>>
    %c0_i32_27 = arith.constant 0 : i32
    %c63_i32_28 = arith.constant 63 : i32
    %113 = arith.maxsi %c0_i32_27, %112 : i32
    %114 = arith.minsi %c63_i32_28, %113 : i32
    %115 = arith.index_cast %114 : i32 to index
    %c0_29 = arith.constant 0 : index
    %116 = vector.load %arg2[%115, %c0_29] : memref<64x384xf32, #tpu.memory_space<vmem>>, vector<1x384xf32>
    %cst_30 = arith.constant dense<0.000000e+00> : vector<1x384xf32>
    %117 = tpu.matmul %108, %0, %cst_30 {dimension_numbers = #tpu.dot_dimension_numbers<[1], [0], [0], [1], [0, 0, 1, 1], [], []>} : vector<1x128xf32>, vector<128x384xf32>, vector<1x384xf32> -> vector<1x384xf32>
    %118 = arith.addf %117, %1 : vector<1x384xf32>
    %119 = vector.extract_strided_slice %116 {offsets = [0, 0], sizes = [1, 128], strides = [1, 1]} : vector<1x384xf32> to vector<1x128xf32>
    %120 = vector.extract_strided_slice %118 {offsets = [0, 0], sizes = [1, 128], strides = [1, 1]} : vector<1x384xf32> to vector<1x128xf32>
    %121 = arith.addf %119, %120 : vector<1x128xf32>
    %122 = arith.negf %121 : vector<1x128xf32>
    %123 = math.exp %122 : vector<1x128xf32>
    %cst_31 = arith.constant 1.000000e+00 : f32
    %124 = vector.broadcast %cst_31 : f32 to vector<1x128xf32>
    %125 = arith.addf %124, %123 : vector<1x128xf32>
    %126 = arith.divf %124, %125 : vector<1x128xf32>
    %127 = vector.extract_strided_slice %116 {offsets = [0, 128], sizes = [1, 128], strides = [1, 1]} : vector<1x384xf32> to vector<1x128xf32>
    %128 = vector.extract_strided_slice %118 {offsets = [0, 128], sizes = [1, 128], strides = [1, 1]} : vector<1x384xf32> to vector<1x128xf32>
    %129 = arith.addf %127, %128 : vector<1x128xf32>
    %130 = arith.negf %129 : vector<1x128xf32>
    %131 = math.exp %130 : vector<1x128xf32>
    %cst_32 = arith.constant 1.000000e+00 : f32
    %132 = vector.broadcast %cst_32 : f32 to vector<1x128xf32>
    %133 = arith.addf %132, %131 : vector<1x128xf32>
    %134 = arith.divf %132, %133 : vector<1x128xf32>
    %135 = vector.extract_strided_slice %116 {offsets = [0, 256], sizes = [1, 128], strides = [1, 1]} : vector<1x384xf32> to vector<1x128xf32>
    %136 = vector.extract_strided_slice %118 {offsets = [0, 256], sizes = [1, 128], strides = [1, 1]} : vector<1x384xf32> to vector<1x128xf32>
    %137 = arith.mulf %126, %136 : vector<1x128xf32>
    %138 = arith.addf %135, %137 : vector<1x128xf32>
    %139 = math.tanh %138 : vector<1x128xf32>
    %cst_33 = arith.constant 1.000000e+00 : f32
    %140 = vector.broadcast %cst_33 : f32 to vector<1x128xf32>
    %141 = arith.subf %140, %134 : vector<1x128xf32>
    %142 = arith.mulf %141, %139 : vector<1x128xf32>
    %143 = arith.mulf %134, %108 : vector<1x128xf32>
    %144 = arith.addf %142, %143 : vector<1x128xf32>
    %145 = arith.index_cast %c3_i32 : i32 to index
    %c0_34 = arith.constant 0 : index
    %146 = vector.load %arg6[%145, %c0_34] : memref<8x128xf32, #tpu.memory_space<vmem>>, vector<1x128xf32>
    tpu.vector_store %arg6[%145, %c0_34], %144 {strides = array<i32>} : memref<8x128xf32, #tpu.memory_space<vmem>>, vector<1x128xf32>,
    %c4_i32 = arith.constant 4 : i32
    %147 = arith.index_cast %c4_i32 : i32 to index
    %148 = memref.load %arg1[%147] : memref<8xi32, #tpu.memory_space<smem>>
    %c0_i32_35 = arith.constant 0 : i32
    %c63_i32_36 = arith.constant 63 : i32
    %149 = arith.maxsi %c0_i32_35, %148 : i32
    %150 = arith.minsi %c63_i32_36, %149 : i32
    %151 = arith.index_cast %150 : i32 to index
    %c0_37 = arith.constant 0 : index
    %152 = vector.load %arg2[%151, %c0_37] : memref<64x384xf32, #tpu.memory_space<vmem>>, vector<1x384xf32>
    %cst_38 = arith.constant dense<0.000000e+00> : vector<1x384xf32>
    %153 = tpu.matmul %144, %0, %cst_38 {dimension_numbers = #tpu.dot_dimension_numbers<[1], [0], [0], [1], [0, 0, 1, 1], [], []>} : vector<1x128xf32>, vector<128x384xf32>, vector<1x384xf32> -> vector<1x384xf32>
    %154 = arith.addf %153, %1 : vector<1x384xf32>
    %155 = vector.extract_strided_slice %152 {offsets = [0, 0], sizes = [1, 128], strides = [1, 1]} : vector<1x384xf32> to vector<1x128xf32>
    %156 = vector.extract_strided_slice %154 {offsets = [0, 0], sizes = [1, 128], strides = [1, 1]} : vector<1x384xf32> to vector<1x128xf32>
    %157 = arith.addf %155, %156 : vector<1x128xf32>
    %158 = arith.negf %157 : vector<1x128xf32>
    %159 = math.exp %158 : vector<1x128xf32>
    %cst_39 = arith.constant 1.000000e+00 : f32
    %160 = vector.broadcast %cst_39 : f32 to vector<1x128xf32>
    %161 = arith.addf %160, %159 : vector<1x128xf32>
    %162 = arith.divf %160, %161 : vector<1x128xf32>
    %163 = vector.extract_strided_slice %152 {offsets = [0, 128], sizes = [1, 128], strides = [1, 1]} : vector<1x384xf32> to vector<1x128xf32>
    %164 = vector.extract_strided_slice %154 {offsets = [0, 128], sizes = [1, 128], strides = [1, 1]} : vector<1x384xf32> to vector<1x128xf32>
    %165 = arith.addf %163, %164 : vector<1x128xf32>
    %166 = arith.negf %165 : vector<1x128xf32>
    %167 = math.exp %166 : vector<1x128xf32>
    %cst_40 = arith.constant 1.000000e+00 : f32
    %168 = vector.broadcast %cst_40 : f32 to vector<1x128xf32>
    %169 = arith.addf %168, %167 : vector<1x128xf32>
    %170 = arith.divf %168, %169 : vector<1x128xf32>
    %171 = vector.extract_strided_slice %152 {offsets = [0, 256], sizes = [1, 128], strides = [1, 1]} : vector<1x384xf32> to vector<1x128xf32>
    %172 = vector.extract_strided_slice %154 {offsets = [0, 256], sizes = [1, 128], strides = [1, 1]} : vector<1x384xf32> to vector<1x128xf32>
    %173 = arith.mulf %162, %172 : vector<1x128xf32>
    %174 = arith.addf %171, %173 : vector<1x128xf32>
    %175 = math.tanh %174 : vector<1x128xf32>
    %cst_41 = arith.constant 1.000000e+00 : f32
    %176 = vector.broadcast %cst_41 : f32 to vector<1x128xf32>
    %177 = arith.subf %176, %170 : vector<1x128xf32>
    %178 = arith.mulf %177, %175 : vector<1x128xf32>
    %179 = arith.mulf %170, %144 : vector<1x128xf32>
    %180 = arith.addf %178, %179 : vector<1x128xf32>
    %181 = arith.index_cast %c4_i32 : i32 to index
    %c0_42 = arith.constant 0 : index
    %182 = vector.load %arg6[%181, %c0_42] : memref<8x128xf32, #tpu.memory_space<vmem>>, vector<1x128xf32>
    tpu.vector_store %arg6[%181, %c0_42], %180 {strides = array<i32>} : memref<8x128xf32, #tpu.memory_space<vmem>>, vector<1x128xf32>,
    %c5_i32 = arith.constant 5 : i32
    %183 = arith.index_cast %c5_i32 : i32 to index
    %184 = memref.load %arg1[%183] : memref<8xi32, #tpu.memory_space<smem>>
    %c0_i32_43 = arith.constant 0 : i32
    %c63_i32_44 = arith.constant 63 : i32
    %185 = arith.maxsi %c0_i32_43, %184 : i32
    %186 = arith.minsi %c63_i32_44, %185 : i32
    %187 = arith.index_cast %186 : i32 to index
    %c0_45 = arith.constant 0 : index
    %188 = vector.load %arg2[%187, %c0_45] : memref<64x384xf32, #tpu.memory_space<vmem>>, vector<1x384xf32>
    %cst_46 = arith.constant dense<0.000000e+00> : vector<1x384xf32>
    %189 = tpu.matmul %180, %0, %cst_46 {dimension_numbers = #tpu.dot_dimension_numbers<[1], [0], [0], [1], [0, 0, 1, 1], [], []>} : vector<1x128xf32>, vector<128x384xf32>, vector<1x384xf32> -> vector<1x384xf32>
    %190 = arith.addf %189, %1 : vector<1x384xf32>
    %191 = vector.extract_strided_slice %188 {offsets = [0, 0], sizes = [1, 128], strides = [1, 1]} : vector<1x384xf32> to vector<1x128xf32>
    %192 = vector.extract_strided_slice %190 {offsets = [0, 0], sizes = [1, 128], strides = [1, 1]} : vector<1x384xf32> to vector<1x128xf32>
    %193 = arith.addf %191, %192 : vector<1x128xf32>
    %194 = arith.negf %193 : vector<1x128xf32>
    %195 = math.exp %194 : vector<1x128xf32>
    %cst_47 = arith.constant 1.000000e+00 : f32
    %196 = vector.broadcast %cst_47 : f32 to vector<1x128xf32>
    %197 = arith.addf %196, %195 : vector<1x128xf32>
    %198 = arith.divf %196, %197 : vector<1x128xf32>
    %199 = vector.extract_strided_slice %188 {offsets = [0, 128], sizes = [1, 128], strides = [1, 1]} : vector<1x384xf32> to vector<1x128xf32>
    %200 = vector.extract_strided_slice %190 {offsets = [0, 128], sizes = [1, 128], strides = [1, 1]} : vector<1x384xf32> to vector<1x128xf32>
    %201 = arith.addf %199, %200 : vector<1x128xf32>
    %202 = arith.negf %201 : vector<1x128xf32>
    %203 = math.exp %202 : vector<1x128xf32>
    %cst_48 = arith.constant 1.000000e+00 : f32
    %204 = vector.broadcast %cst_48 : f32 to vector<1x128xf32>
    %205 = arith.addf %204, %203 : vector<1x128xf32>
    %206 = arith.divf %204, %205 : vector<1x128xf32>
    %207 = vector.extract_strided_slice %188 {offsets = [0, 256], sizes = [1, 128], strides = [1, 1]} : vector<1x384xf32> to vector<1x128xf32>
    %208 = vector.extract_strided_slice %190 {offsets = [0, 256], sizes = [1, 128], strides = [1, 1]} : vector<1x384xf32> to vector<1x128xf32>
    %209 = arith.mulf %198, %208 : vector<1x128xf32>
    %210 = arith.addf %207, %209 : vector<1x128xf32>
    %211 = math.tanh %210 : vector<1x128xf32>
    %cst_49 = arith.constant 1.000000e+00 : f32
    %212 = vector.broadcast %cst_49 : f32 to vector<1x128xf32>
    %213 = arith.subf %212, %206 : vector<1x128xf32>
    %214 = arith.mulf %213, %211 : vector<1x128xf32>
    %215 = arith.mulf %206, %180 : vector<1x128xf32>
    %216 = arith.addf %214, %215 : vector<1x128xf32>
    %217 = arith.index_cast %c5_i32 : i32 to index
    %c0_50 = arith.constant 0 : index
    %218 = vector.load %arg6[%217, %c0_50] : memref<8x128xf32, #tpu.memory_space<vmem>>, vector<1x128xf32>
    tpu.vector_store %arg6[%217, %c0_50], %216 {strides = array<i32>} : memref<8x128xf32, #tpu.memory_space<vmem>>, vector<1x128xf32>,
    %c6_i32 = arith.constant 6 : i32
    %219 = arith.index_cast %c6_i32 : i32 to index
    %220 = memref.load %arg1[%219] : memref<8xi32, #tpu.memory_space<smem>>
    %c0_i32_51 = arith.constant 0 : i32
    %c63_i32_52 = arith.constant 63 : i32
    %221 = arith.maxsi %c0_i32_51, %220 : i32
    %222 = arith.minsi %c63_i32_52, %221 : i32
    %223 = arith.index_cast %222 : i32 to index
    %c0_53 = arith.constant 0 : index
    %224 = vector.load %arg2[%223, %c0_53] : memref<64x384xf32, #tpu.memory_space<vmem>>, vector<1x384xf32>
    %cst_54 = arith.constant dense<0.000000e+00> : vector<1x384xf32>
    %225 = tpu.matmul %216, %0, %cst_54 {dimension_numbers = #tpu.dot_dimension_numbers<[1], [0], [0], [1], [0, 0, 1, 1], [], []>} : vector<1x128xf32>, vector<128x384xf32>, vector<1x384xf32> -> vector<1x384xf32>
    %226 = arith.addf %225, %1 : vector<1x384xf32>
    %227 = vector.extract_strided_slice %224 {offsets = [0, 0], sizes = [1, 128], strides = [1, 1]} : vector<1x384xf32> to vector<1x128xf32>
    %228 = vector.extract_strided_slice %226 {offsets = [0, 0], sizes = [1, 128], strides = [1, 1]} : vector<1x384xf32> to vector<1x128xf32>
    %229 = arith.addf %227, %228 : vector<1x128xf32>
    %230 = arith.negf %229 : vector<1x128xf32>
    %231 = math.exp %230 : vector<1x128xf32>
    %cst_55 = arith.constant 1.000000e+00 : f32
    %232 = vector.broadcast %cst_55 : f32 to vector<1x128xf32>
    %233 = arith.addf %232, %231 : vector<1x128xf32>
    %234 = arith.divf %232, %233 : vector<1x128xf32>
    %235 = vector.extract_strided_slice %224 {offsets = [0, 128], sizes = [1, 128], strides = [1, 1]} : vector<1x384xf32> to vector<1x128xf32>
    %236 = vector.extract_strided_slice %226 {offsets = [0, 128], sizes = [1, 128], strides = [1, 1]} : vector<1x384xf32> to vector<1x128xf32>
    %237 = arith.addf %235, %236 : vector<1x128xf32>
    %238 = arith.negf %237 : vector<1x128xf32>
    %239 = math.exp %238 : vector<1x128xf32>
    %cst_56 = arith.constant 1.000000e+00 : f32
    %240 = vector.broadcast %cst_56 : f32 to vector<1x128xf32>
    %241 = arith.addf %240, %239 : vector<1x128xf32>
    %242 = arith.divf %240, %241 : vector<1x128xf32>
    %243 = vector.extract_strided_slice %224 {offsets = [0, 256], sizes = [1, 128], strides = [1, 1]} : vector<1x384xf32> to vector<1x128xf32>
    %244 = vector.extract_strided_slice %226 {offsets = [0, 256], sizes = [1, 128], strides = [1, 1]} : vector<1x384xf32> to vector<1x128xf32>
    %245 = arith.mulf %234, %244 : vector<1x128xf32>
    %246 = arith.addf %243, %245 : vector<1x128xf32>
    %247 = math.tanh %246 : vector<1x128xf32>
    %cst_57 = arith.constant 1.000000e+00 : f32
    %248 = vector.broadcast %cst_57 : f32 to vector<1x128xf32>
    %249 = arith.subf %248, %242 : vector<1x128xf32>
    %250 = arith.mulf %249, %247 : vector<1x128xf32>
    %251 = arith.mulf %242, %216 : vector<1x128xf32>
    %252 = arith.addf %250, %251 : vector<1x128xf32>
    %253 = arith.index_cast %c6_i32 : i32 to index
    %c0_58 = arith.constant 0 : index
    %254 = vector.load %arg6[%253, %c0_58] : memref<8x128xf32, #tpu.memory_space<vmem>>, vector<1x128xf32>
    tpu.vector_store %arg6[%253, %c0_58], %252 {strides = array<i32>} : memref<8x128xf32, #tpu.memory_space<vmem>>, vector<1x128xf32>,
    %c7_i32 = arith.constant 7 : i32
    %255 = arith.index_cast %c7_i32 : i32 to index
    %256 = memref.load %arg1[%255] : memref<8xi32, #tpu.memory_space<smem>>
    %c0_i32_59 = arith.constant 0 : i32
    %c63_i32_60 = arith.constant 63 : i32
    %257 = arith.maxsi %c0_i32_59, %256 : i32
    %258 = arith.minsi %c63_i32_60, %257 : i32
    %259 = arith.index_cast %258 : i32 to index
    %c0_61 = arith.constant 0 : index
    %260 = vector.load %arg2[%259, %c0_61] : memref<64x384xf32, #tpu.memory_space<vmem>>, vector<1x384xf32>
    %cst_62 = arith.constant dense<0.000000e+00> : vector<1x384xf32>
    %261 = tpu.matmul %252, %0, %cst_62 {dimension_numbers = #tpu.dot_dimension_numbers<[1], [0], [0], [1], [0, 0, 1, 1], [], []>} : vector<1x128xf32>, vector<128x384xf32>, vector<1x384xf32> -> vector<1x384xf32>
    %262 = arith.addf %261, %1 : vector<1x384xf32>
    %263 = vector.extract_strided_slice %260 {offsets = [0, 0], sizes = [1, 128], strides = [1, 1]} : vector<1x384xf32> to vector<1x128xf32>
    %264 = vector.extract_strided_slice %262 {offsets = [0, 0], sizes = [1, 128], strides = [1, 1]} : vector<1x384xf32> to vector<1x128xf32>
    %265 = arith.addf %263, %264 : vector<1x128xf32>
    %266 = arith.negf %265 : vector<1x128xf32>
    %267 = math.exp %266 : vector<1x128xf32>
    %cst_63 = arith.constant 1.000000e+00 : f32
    %268 = vector.broadcast %cst_63 : f32 to vector<1x128xf32>
    %269 = arith.addf %268, %267 : vector<1x128xf32>
    %270 = arith.divf %268, %269 : vector<1x128xf32>
    %271 = vector.extract_strided_slice %260 {offsets = [0, 128], sizes = [1, 128], strides = [1, 1]} : vector<1x384xf32> to vector<1x128xf32>
    %272 = vector.extract_strided_slice %262 {offsets = [0, 128], sizes = [1, 128], strides = [1, 1]} : vector<1x384xf32> to vector<1x128xf32>
    %273 = arith.addf %271, %272 : vector<1x128xf32>
    %274 = arith.negf %273 : vector<1x128xf32>
    %275 = math.exp %274 : vector<1x128xf32>
    %cst_64 = arith.constant 1.000000e+00 : f32
    %276 = vector.broadcast %cst_64 : f32 to vector<1x128xf32>
    %277 = arith.addf %276, %275 : vector<1x128xf32>
    %278 = arith.divf %276, %277 : vector<1x128xf32>
    %279 = vector.extract_strided_slice %260 {offsets = [0, 256], sizes = [1, 128], strides = [1, 1]} : vector<1x384xf32> to vector<1x128xf32>
    %280 = vector.extract_strided_slice %262 {offsets = [0, 256], sizes = [1, 128], strides = [1, 1]} : vector<1x384xf32> to vector<1x128xf32>
    %281 = arith.mulf %270, %280 : vector<1x128xf32>
    %282 = arith.addf %279, %281 : vector<1x128xf32>
    %283 = math.tanh %282 : vector<1x128xf32>
    %cst_65 = arith.constant 1.000000e+00 : f32
    %284 = vector.broadcast %cst_65 : f32 to vector<1x128xf32>
    %285 = arith.subf %284, %278 : vector<1x128xf32>
    %286 = arith.mulf %285, %283 : vector<1x128xf32>
    %287 = arith.mulf %278, %252 : vector<1x128xf32>
    %288 = arith.addf %286, %287 : vector<1x128xf32>
    %289 = arith.index_cast %c7_i32 : i32 to index
    %c0_66 = arith.constant 0 : index
    %290 = vector.load %arg6[%289, %c0_66] : memref<8x128xf32, #tpu.memory_space<vmem>>, vector<1x128xf32>
    tpu.vector_store %arg6[%289, %c0_66], %288 {strides = array<i32>} : memref<8x128xf32, #tpu.memory_space<vmem>>, vector<1x128xf32>,
    %c8_i32 = arith.constant 8 : i32
    return
  }
  func.func @transform_0(%arg0: i32, %arg1: memref<8xi32, #tpu.memory_space<smem>>) -> (i32, i32) {
    %c0_i32 = arith.constant 0 : i32
    %c0_i32_0 = arith.constant 0 : i32
    %c0_i32_1 = arith.constant 0 : i32
    return %c0_i32, %c0_i32_0 : i32, i32
  }
  func.func @transform_1(%arg0: i32, %arg1: memref<8xi32, #tpu.memory_space<smem>>) -> (i32, i32) {
    %c0_i32 = arith.constant 0 : i32
    %c0_i32_0 = arith.constant 0 : i32
    %c0_i32_1 = arith.constant 0 : i32
    return %c0_i32, %c0_i32_0 : i32, i32
  }
  func.func @transform_2(%arg0: i32, %arg1: memref<8xi32, #tpu.memory_space<smem>>) -> (i32, i32) {
    %c0_i32 = arith.constant 0 : i32
    %c0_i32_0 = arith.constant 0 : i32
    %c0_i32_1 = arith.constant 0 : i32
    return %c0_i32, %c0_i32_0 : i32, i32
  }
  func.func @transform_3(%arg0: i32, %arg1: memref<8xi32, #tpu.memory_space<smem>>) -> (i32, i32) {
    %c0_i32 = arith.constant 0 : i32
    %c0_i32_0 = arith.constant 0 : i32
    %c0_i32_1 = arith.constant 0 : i32
    return %c0_i32, %c0_i32_0 : i32, i32
  }
  func.func @transform_4(%arg0: i32, %arg1: memref<8xi32, #tpu.memory_space<smem>>) -> (i32, i32) {
    %c0_i32 = arith.constant 0 : i32
    %c0_i32_0 = arith.constant 0 : i32
    %c0_i32_1 = arith.constant 0 : i32
    return %c0_i32, %c0_i32_0 : i32, i32
  }
}

</mosaic_0001>

<bundles_post_ra>
// kernel: tpu_custom_call.1
= control target key start
LH: loop header
LB: loop body
LE: loop exit
PB: predicated region body
PF: predicated region fallthrough
CT: control target
= control target key end

     0   :  { %s3229_s0 = inlined_call_operand.hbm [shape: s32[8], index: 0, kind: input, shape index: {}]   ;;  %s3230_s1 = inlined_call_operand.hbm [shape: f32[64,384], index: 1, kind: input, shape index: {}]   ;;  %s3231_s2 = inlined_call_operand.hbm [shape: f32[128,384], index: 2, kind: input, shape index: {}]   ;;  %s3232_s3 = inlined_call_operand.vmem [shape: f32[1,384], index: 3, kind: input, shape index: {}]   ;;  %s3233_s4 = inlined_call_operand.vmem [shape: f32[1,128], index: 4, kind: input, shape index: {}]   ;;  %s3234_s5 = inlined_call_operand.hbm [shape: f32[8,128], index: 5, kind: output, shape index: {}]  }
   0x1   :  { %s2653_s20 = scalar_lea.hbm %s3229_s0, 16 }
   0x2   :  { %p2654_p0 = scmp.ne.s32.totalorder %s3229_s0, %s2653_s20  ;;  %p2657_p1 = scmp.lt.u32.totalorder %s2653_s20, %s3229_s0 }
   0x4   :  { %p2659_p2 = pnand %p2657_p1, %p2654_p0 }
   0x6   :  { %2662 = shalt.err (!%p2659_p2)  }
   0x7   :  { %s2737_s25 = smov [#allocation3]  }
   0x8   :  { %11 = dma.hbm_to_smem %s3229_s0, 16, %s2737_s25, [#allocation2] }
   0x9   :  { %2729 = dma.done.wait [#allocation2], 16 }
   0xa   :  { %2730 = vsyncadd [#allocation2], 4294967280 }
   0xb   :  { %13 = sfence }
   0xc   :  { %14 = vsyncpa [#allocation5], 0 }
   0xd   :  { %15 = vsyncpa [#allocation8], 0 }
   0xe   :  { %16 = vsyncpa [#allocation6], 0  ;;  %s2738_s28 = smov [#allocation4]   ;;  %s2663_s7 = scalar_lea.hbm %s3230_s1, 3072 }
   0xf   :  { %s22_s29 = sshll.u32 %s2738_s28, 4  ;;  %p2664_p3 = scmp.ne.s32.totalorder %s3230_s1, %s2663_s7  ;;  %s23_s29 = int_to_ptr.vmem [resolvable:$true] %s22_s29 }
  0x10   :  { %p2667_p4 = scmp.lt.u32.totalorder %s2663_s7, %s3230_s1 }
  0x12   :  { %p2669_p5 = pnand %p2667_p4, %p2664_p3 }
  0x14   :  { %2672 = shalt.err (!%p2669_p5)
}
  0x15   :  { %s2673_s0 = scalar_lea.vmem %s23_s29, 3072  ;;  %p2678_p7 = scmp.lt.s32.totalorder %s23_s29, %s23_s29 }
  0x16   :  { %p2674_p6 = scmp.ne.s32.totalorder %s23_s29, %s2673_s0  ;;  %p2679_p8 = scmp.lt.s32.totalorder %s2673_s0, %s2673_s0 }
  0x18   :  { %p2680_p9 = por %p2679_p8, %p2678_p7 }
  0x1a   :  { %p2681_p10 = pnand %p2680_p9, %p2674_p6 }
  0x1c   :  { %2684 = shalt.err (!%p2681_p10)
}
  0x1d   :  { %s2739_s12 = smov 384   ;;  %s2740_s13 = smov 24  }
  0x1e   :  { %28 = dma.hbm_to_vmem [thread:$0]  %s3230_s1, 3072, %s23_s29, [#allocation5], %s2739_s12, %s2739_s12, %s2740_s13  }
  0x1f   :  { %s2741_s16 = smov [#allocation7]   ;;  %s2685_s20 = scalar_lea.hbm %s3231_s2, 6144 }
  0x20   :  { %s34_s17 = sshll.u32 %s2741_s16, 4  ;;  %p2686_p11 = scmp.ne.s32.totalorder %s3231_s2, %s2685_s20  ;;  %s35_s17 = int_to_ptr.vmem [resolvable:$true] %s34_s17 }
  0x21   :  { %p2689_p12 = scmp.lt.u32.totalorder %s2685_s20, %s3231_s2 }
  0x23   :  { %p2691_p13 = pnand %p2689_p12, %p2686_p11 }
  0x25   :  { %2694 = shalt.err (!%p2691_p13)
}
  0x26   :  { %s2695_s25 = scalar_lea.vmem %s35_s17, 6144  ;;  %p2700_p1 = scmp.lt.s32.totalorder %s35_s17, %s35_s17 }
  0x27   :  { %p2696_p0 = scmp.ne.s32.totalorder %s35_s17, %s2695_s25  ;;  %p2701_p2 = scmp.lt.s32.totalorder %s2695_s25, %s2695_s25 }
  0x29   :  { %p2702_p3 = por %p2701_p2, %p2700_p1 }
  0x2b   :  { %p2703_p4 = pnand %p2702_p3, %p2696_p0 }
  0x2d   :  { %2706 = shalt.err (!%p2703_p4)
}
  0x2e   :  { %40 = dma.hbm_to_vmem [thread:$0]  %s3231_s2, 6144, %s35_s17, [#allocation8], %s2739_s12, %s2739_s12, %s2740_s13  }
  0x2f   :  { %2731 = dma.done.wait [#allocation5], 3072  }
  0x30   :  { %2732 = vsyncadd [#allocation5], 4294964224 }
  0x31   :  { %2733 = dma.done.wait [#allocation8], 6144  }
  0x32   :  { %2734 = vsyncadd [#allocation8], 4294961152  ;;  %v2742_v0 = vmov 0.0|0.0   ;;  %v2743_v1 = vmov 0.0   ;;  %vm2744_vm0 = vmmov 0   ;;  %v52_v2 = vld [vmem:[#allocation7 + $0x8] sm:$0xff] }
  0x33   :  { %2148 = vmatprep.subr.bf16.mxu1 %v2742_v0  ;;  %195 = vmatprep.mubr.f32.mxu0 %v2743_v1  ;;  %v55_v3 = vld [vmem:[#allocation7 + $0x20] sm:$0xff]  ;;  %v54_v6 = vld [vmem:[#allocation7 + $0x18] sm:$0xff]  ;;  %v61_v8 = vld [vmem:[#allocation7 + $0x50] sm:$0xff]  ;;  %s1630_s14 = sld [smem:[#allocation3 + $0x2]]  ;;  %s1639_s20 = sld [smem:[#allocation3 + $0x3]] }
  0x34   :  { %1868 = vmatprep.mubr.msk.f32.mxu1 %vm2744_vm0, %v2743_v1  ;;  %v51_v4 = vld [vmem:[#allocation7] sm:$0xff]  ;;  %v2816_v5 = vpack.c.bf16 %v55_v3, %v52_v2  ;;  %v58_v7 = vld [vmem:[#allocation7 + $0x38] sm:$0xff]  ;;  %v57_v11 = vld [vmem:[#allocation7 + $0x30] sm:$0xff]  ;;  %s1648_s1 = sld [smem:[#allocation3 + $0x4]] }
  0x35   :  { %v2818_v9 = vpack.c.bf16 %v54_v6, %v51_v4  ;;  %v2820_v10 = vpack.c.bf16 %v61_v8, %v58_v7  ;;  %v60_v12 = vld [vmem:[#allocation7 + $0x48] sm:$0xff]  ;;  %v67_v14 = vld [vmem:[#allocation7 + $0x80] sm:$0xff]  ;;  %v66_v18 = vld [vmem:[#allocation7 + $0x78] sm:$0xff] }
  0x36   :  { %v64_v13 = vld [vmem:[#allocation7 + $0x68] sm:$0xff]  ;;  %2117 = vmatprep.subr.bf16.mxu0 %v2816_v5  ;;  %v2824_v15 = vpack.c.bf16 %v60_v12, %v57_v11  ;;  %v63_v17 = vld [vmem:[#allocation7 + $0x60] sm:$0xff]  ;;  %v70_v19 = vld [vmem:[#allocation7 + $0x98] sm:$0xff] }
  0x37   :  { %2119 = vmatpush1.bf16.msra.mxu0 %v2818_v9  ;;  %v2827_v16 = vpack.c.bf16 %v67_v14, %v64_v13  ;;  %v73_v20 = vld [vmem:[#allocation7 + $0xb0] sm:$0xff]  ;;  %v2830_v21 = vpack.c.bf16 %v66_v18, %v63_v17  ;;  %v72_v24 = vld [vmem:[#allocation7 + $0xa8] sm:$0xff]  ;;  %v79_v26 = vld [vmem:[#allocation7 + $0xe0] sm:$0xff]  ;;  %v116_v18 = vlaneseq }
  0x38   :  { %2121 = vmatprep.subr.bf16.mxu0 %v2820_v10  ;;  %v2833_v22 = vpack.c.bf16 %v73_v20, %v70_v19  ;;  %v69_v23 = vld [vmem:[#allocation7 + $0x90] sm:$0xff]  ;;  %v76_v25 = vld [vmem:[#allocation7 + $0xc8] sm:$0xff]  ;;  %v59_v30 = vld [vmem:[#allocation7 + $0x40] sm:$0xff] }
  0x39   :  { %v53_v27 = vld [vmem:[#allocation7 + $0x10] sm:$0xff]  ;;  %v56_v28 = vld [vmem:[#allocation7 + $0x28] sm:$0xff]  ;;  %v2838_v31 = vpack.c.bf16 %v72_v24, %v69_v23  ;;  %v62_v32 = vld [vmem:[#allocation7 + $0x58] sm:$0xff]  ;;  %v2841_v33 = vpack.c.bf16 %v79_v26, %v76_v25  ;;  %v117_v19 = vshrl.u32 %v116_v18, 7  ;;  %p482_p9 = scmp.gt.s32.totalorder %s1630_s14, 0  ;;  %p1631_p10 = scmp.lt.s32.totalorder %s1630_s14, 63 }
  0x3a   :  { %v2835_v29 = vpack.c.bf16 %v56_v28, %v53_v27  ;;  %v75_v34 = vld [vmem:[#allocation7 + $0xc0] sm:$0xff]  ;;  %v78_v35 = vld [vmem:[#allocation7 + $0xd8] sm:$0xff]  ;;  %v2844_v37 = vpack.c.bf16 %v62_v32, %v59_v30  ;;  %v85_v38 = vld [vmem:[#allocation7 + $0x110] sm:$0xff]  ;;  %p664_p11 = scmp.gt.s32.totalorder %s1639_s20, 0  ;;  %p1640_p12 = scmp.lt.s32.totalorder %s1639_s20, 63 }
  0x3b   :  { %2123 = vmatpush1.bf16.msra.mxu0 %v2824_v15  ;;  %v82_v36 = vld [vmem:[#allocation7 + $0xf8] sm:$0xff]  ;;  %v65_v39 = vld [vmem:[#allocation7 + $0x70] sm:$0xff]  ;;  %v68_v40 = vld [vmem:[#allocation7 + $0x88] sm:$0xff]  ;;  %v2848_v41 = vpack.c.bf16 %v78_v35, %v75_v34  ;;  %v118_v20 = vsub.s32 0, %v117_v19  ;;  %v122_v24 = vsub.s32 1, %v117_v19  ;;  %s3244_s14 = smov (!%p482_p9, %s1630_s14), 0 }
  0x3c   :  { %2125 = vmatprep.subr.bf16.mxu0 %v2827_v16  ;;  %2150 = vmatpush3.bf16.msra.mxu1 %v2835_v29  ;;  %v2851_v42 = vpack.c.bf16 %v85_v38, %v82_v36  ;;  %v81_v43 = vld [vmem:[#allocation7 + $0xf0] sm:$0xff]  ;;  %v84_v44 = vld [vmem:[#allocation7 + $0x108] sm:$0xff]  ;;  %v2854_v46 = vpack.c.bf16 %v68_v40, %v65_v39  ;;  %v91_v47 = vld [vmem:[#allocation7 + $0x140] sm:$0xff]  ;;  %s3246_s14 = smov (!%p1631_p10, %s3244_s14), 63  ;;  %s3248_s20 = smov (!%p664_p11, %s1639_s20), 0 }
  0x3d   :  { %2151 = vmatprep.subr.bf16.mxu1 %v2742_v0  ;;  %v88_v45 = vld [vmem:[#allocation7 + $0x128] sm:$0xff]  ;;  %v71_v48 = vld [vmem:[#allocation7 + $0xa0] sm:$0xff]  ;;  %v74_v49 = vld [vmem:[#allocation7 + $0xb8] sm:$0xff]  ;;  %v2858_v50 = vpack.c.bf16 %v84_v44, %v81_v43  ;;  %s486_s15 = sshra.s32 %s3246_s14, 3  ;;  %s489_s17 = sand.u32 7, %s3246_s14 }
  0x3e   :  { %v2861_v51 = vpack.c.bf16 %v91_v47, %v88_v45  ;;  %v87_v52 = vld [vmem:[#allocation7 + $0x120] sm:$0xff]  ;;  %v90_v53 = vld [vmem:[#allocation7 + $0x138] sm:$0xff]  ;;  %v2864_v55 = vpack.c.bf16 %v74_v49, %v71_v48  ;;  %v97_v56 = vld [vmem:[#allocation7 + $0x170] sm:$0xff]  ;;  %v126_v48 = vsub.s32 2, %v117_v19  ;;  %s1636_s16 = smul.u32 24, %s486_s15  ;;  %s3250_s20 = smov (!%p1640_p12, %s3248_s20), 63 }
  0x3f   :  { %2127 = vmatpush1.bf16.msra.mxu0 %v2830_v21  ;;  %v94_v54 = vld [vmem:[#allocation7 + $0x158] sm:$0xff]  ;;  %v77_v57 = vld [vmem:[#allocation7 + $0xd0] sm:$0xff]  ;;  %v80_v58 = vld [vmem:[#allocation7 + $0xe8] sm:$0xff]  ;;  %v2868_v59 = vpack.c.bf16 %v90_v53, %v87_v52  ;;  %s668_s21 = sshra.s32 %s3250_s20, 3  ;;  %s671_s23 = sand.u32 7, %s3250_s20 }
  0x40   :  { %2129 = vmatprep.subr.bf16.mxu0 %v2833_v22  ;;  %2153 = vmatpush3.bf16.msra.mxu1 %v2844_v37  ;;  %v2871_v60 = vpack.c.bf16 %v97_v56, %v94_v54  ;;  %v93_v61 = vld [vmem:[#allocation7 + $0x150] sm:$0xff]  ;;  %v96_v62 = vld [vmem:[#allocation7 + $0x168] sm:$0xff]  ;;  %v2874_v63 = vpack.c.bf16 %v80_v58, %v77_v57  ;;  %v83_v2 = vld [vmem:[#allocation7 + $0x100] sm:$0xff]  ;;  %s492_s18 = sadd.s32 %s1636_s16, %s489_s17  ;;  %s1645_s22 = smul.u32 24, %s668_s21 }
  0x41   :  { %2154 = vmatprep.subr.bf16.mxu1 %v2742_v0  ;;  %v86_v3 = vld [vmem:[#allocation7 + $0x118] sm:$0xff]  ;;  %v2878_v4 = vpack.c.bf16 %v96_v62, %v93_v61  ;;  %v89_v7 = vld [vmem:[#allocation7 + $0x130] sm:$0xff]  ;;  %v92_v8 = vld [vmem:[#allocation7 + $0x148] sm:$0xff]  ;;  %s493_s19 = scalar_lea.vmem [#allocation4], %s492_s18  ;;  %p846_p13 = scmp.gt.s32.totalorder %s1648_s1, 0 }
  0x42   :  { %v2882_v6 = vpack.c.bf16 %v86_v3, %v83_v2  ;;  %v2889_v11 = vld [vmem:[%s3233_s4] sm:$0x1]  ;;  %v2892_v12 = vpack.c.bf16 %v92_v8, %v89_v7  ;;  %v95_v13 = vld [vmem:[#allocation7 + $0x160] sm:$0xff]  ;;  %s101_s4 = sld [smem:[#allocation3]]  ;;  %s674_s24 = sadd.s32 %s1645_s22, %s671_s23 }
  0x43   :  { %2131 = vmatpush1.bf16.msra.mxu0 %v2838_v31  ;;  %v98_v14 = vld [vmem:[#allocation7 + $0x178] sm:$0xff]  ;;  %s675_s25 = scalar_lea.vmem [#allocation4], %s674_s24  ;;  %p1649_p0 = scmp.lt.s32.totalorder %s1648_s1, 63 }
  0x44   :  { %2133 = vmatprep.subr.bf16.mxu0 %v2841_v33  ;;  %2156 = vmatpush3.bf16.msra.mxu1 %v2854_v46  ;;  %v2900_v17 = vpack.c.bf16 %v98_v14, %v95_v13  ;;  %v99_v23 = vld [vmem:[%s3232_s3] sm:$0x7]  ;;  %s1621_s3 = sld [smem:[#allocation3 + $0x1]]  ;;  %s3252_s1 = smov (!%p846_p13, %s1648_s1), 0 }
  0x45   :  { %2157 = vmatprep.subr.bf16.mxu1 %v2742_v0  ;;  %v2942_v25 = vrot.slane %v99_v23, %v118_v20  ;;  %v2944_v26 = vrot.slane %v99_v23, %v122_v24  ;;  %v2948_v49 = vrot.slane %v99_v23, %v126_v48  ;;  %s3254_s1 = smov (!%p1649_p0, %s3252_s1), 63  ;;  %s1675_s14 = sld [smem:[#allocation3 + $0x7]] }
  0x46   :  { %s850_s26 = sshra.s32 %s3254_s1, 3  ;;  %s853_s27 = sand.u32 7, %s3254_s1 }
  0x47   :  { %2135 = vmatpush1.bf16.msra.mxu0 %v2848_v41  ;;  %s1654_s2 = smul.u32 24, %s850_s26  ;;  %s2745_s20 = smov [#allocation9]  }
  0x48   :  { %2137 = vmatprep.subr.bf16.mxu0 %v2851_v42  ;;  %2159 = vmatpush3.bf16.msra.mxu1 %v2864_v55  ;;  %p102_p5 = scmp.gt.s32.totalorder %s101_s4, 0  ;;  %p1613_p6 = scmp.lt.s32.totalorder %s101_s4, 63 }
  0x49   :  { %2160 = vmatprep.subr.bf16.mxu1 %v2742_v0  ;;  %s1579_s21 = sshll.u32 %s2745_s20, 4  ;;  %s1580_s21 = int_to_ptr.vmem [resolvable:$true] %s1579_s21 }
  0x4a   :  { %s3236_s4 = smov (!%p102_p5, %s101_s4), 0  ;;  %p300_p7 = scmp.gt.s32.totalorder %s1621_s3, 0 }
  0x4b   :  { %2139 = vmatpush1.bf16.msra.mxu0 %v2858_v50  ;;  %s3238_s4 = smov (!%p1613_p6, %s3236_s4), 63  ;;  %p1622_p8 = scmp.lt.s32.totalorder %s1621_s3, 63 }
  0x4c   :  { %2141 = vmatprep.subr.bf16.mxu0 %v2861_v51  ;;  %2162 = vmatpush3.bf16.msra.mxu1 %v2874_v63  ;;  %s106_s28 = sshra.s32 %s3238_s4, 3  ;;  %s109_s30 = sand.u32 7, %s3238_s4 }
  0x4d   :  { %2163 = vmatprep.subr.bf16.mxu1 %v2742_v0  ;;  %s1618_s29 = smul.u32 24, %s106_s28  ;;  %s3240_s3 = smov (!%p300_p7, %s1621_s3), 0 }
  0x4e   :  { %s3242_s3 = smov (!%p1622_p8, %s3240_s3), 63  ;;  %s856_s4 = sadd.s32 %s1654_s2, %s853_s27 }
  0x4f   :  { %2143 = vmatpush1.bf16.msra.mxu0 %v2868_v59  ;;  %s112_s6 = sadd.s32 %s1618_s29, %s109_s30  ;;  %s304_s10 = sshra.s32 %s3242_s3, 3 }
  0x50   :  { %2145 = vmatprep.subr.bf16.mxu0 %v2871_v60  ;;  %2165 = vmatpush3.bf16.msra.mxu1 %v2882_v6  ;;  %s113_s9 = scalar_lea.vmem [#allocation4], %s112_s6  ;;  %s1627_s11 = smul.u32 24, %s304_s10 }
  0x51   :  { %2166 = vmatprep.subr.bf16.mxu1 %v2742_v0  ;;  %v114_v27 = vld [vmem:[%s113_s9] ss:$8 sm:$0x7]  ;;  %s307_s0 = sand.u32 7, %s3242_s3  ;;  %s857_s28 = scalar_lea.vmem [#allocation4], %s856_s4 }
  0x52   :  { %v280_v35 = vrot.slane %v114_v27, 1  ;;  %v290_v56 = vrot.slane %v114_v27, 2  ;;  %s310_s12 = sadd.s32 %s1627_s11, %s307_s0  ;;  %s1657_s29 = sld [smem:[#allocation3 + $0x5]] }
  0x53   :  { %2147 = vmatpush1.bf16.msra.mxu0 %v2878_v4  ;;  %s311_s13 = scalar_lea.vmem [#allocation4], %s310_s12  ;;  %s1666_s3 = sld [smem:[#allocation3 + $0x6]] }
  0x54   :  { %2173 = vmatprep.subr.bf16.mxu0 %v2816_v5  ;;  %2168 = vmatpush3.bf16.msra.mxu1 %v2892_v12  ;;  %p1392_p5 = scmp.gt.s32.totalorder %s1675_s14, 0  ;;  %p1676_p6 = scmp.lt.s32.totalorder %s1675_s14, 63 }
  0x55   :  { %2169 = vmatprep.subr.bf16.mxu1 %v2742_v0  ;;  %s2707_s22 = scalar_lea.vmem %s1580_s21, 128  ;;  %p2712_p8 = scmp.lt.s32.totalorder %s1580_s21, %s1580_s21 }
  0x56   :  { %196 = vmatmul.mubr.f32.vlgmr.msra.gmra.mrb[0].mxu0 %v2889_v11  ;;  %s3264_s14 = smov (!%p1392_p5, %s1675_s14), 0  ;;  %p2708_p7 = scmp.ne.s32.totalorder %s1580_s21, %s2707_s22 }
  0x57   :  { %2175 = vmatpush1.bf16.msra.mxu0 %v2818_v9  ;;  %377 = vmatprep.mubr.f32.mxu0 %v2743_v1  ;;  %s3266_s14 = smov (!%p1676_p6, %s3264_s14), 63  ;;  %p2713_p9 = scmp.lt.s32.totalorder %s2707_s22, %s2707_s22 }
  0x58   :  { %2177 = vmatprep.subr.bf16.mxu0 %v2820_v10  ;;  %2171 = vmatpush3.bf16.msra.mxu1 %v2900_v17  ;;  %p1028_p1 = scmp.gt.s32.totalorder %s1657_s29, 0  ;;  %p1658_p2 = scmp.lt.s32.totalorder %s1657_s29, 63 }
  0x59   :  { %2204 = vmatprep.subr.bf16.mxu1 %v2742_v0  ;;  %p1210_p3 = scmp.gt.s32.totalorder %s1666_s3, 0  ;;  %p1667_p4 = scmp.lt.s32.totalorder %s1666_s3, 63 }
  0x5a   :  { %s3256_s29 = smov (!%p1028_p1, %s1657_s29), 0  ;;  %s1396_s15 = sshra.s32 %s3266_s14, 3 }
  0x5b   :  { %2179 = vmatpush1.bf16.msra.mxu0 %v2824_v15  ;;  %1869 = vmatmul.mubr.f32.vlgmr.msra.gmra.mrb[0].mxu1 %v2889_v11  ;;  %s3258_s29 = smov (!%p1658_p2, %s3256_s29), 63  ;;  %s3260_s3 = smov (!%p1210_p3, %s1666_s3), 0 }
  0x5c   :  { %2181 = vmatprep.subr.bf16.mxu0 %v2827_v16  ;;  %2206 = vmatpush3.bf16.msra.mxu1 %v2835_v29  ;;  %s1032_s30 = sshra.s32 %s3258_s29, 3  ;;  %s1035_s7 = sand.u32 7, %s3258_s29 }
  0x5d   :  { %2207 = vmatprep.subr.bf16.mxu1 %v2742_v0  ;;  %1903 = vmatprep.mubr.msk.f32.mxu1 %vm2744_vm0, %v2743_v1  ;;  %s1663_s6 = smul.u32 24, %s1032_s30  ;;  %s3262_s3 = smov (!%p1667_p4, %s3260_s3), 63 }
  0x5e   :  { %s1214_s10 = sshra.s32 %s3262_s3, 3  ;;  %s1217_s0 = sand.u32 7, %s3262_s3 }
  0x5f   :  { %2183 = vmatpush1.bf16.msra.mxu0 %v2830_v21  ;;  %s1038_s8 = sadd.s32 %s1663_s6, %s1035_s7  ;;  %s1672_s11 = smul.u32 24, %s1214_s10 }
  0x60   :  { %2185 = vmatprep.subr.bf16.mxu0 %v2833_v22  ;;  %2209 = vmatpush3.bf16.msra.mxu1 %v2844_v37  ;;  %s1039_s9 = scalar_lea.vmem [#allocation4], %s1038_s8  ;;  %s1681_s16 = smul.u32 24, %s1396_s15 }
  0x61   :  { %2210 = vmatprep.subr.bf16.mxu1 %v2742_v0  ;;  %s1220_s12 = sadd.s32 %s1672_s11, %s1217_s0  ;;  %s1399_s17 = sand.u32 7, %s3266_s14 }
  0x62   :  { %s1402_s18 = sadd.s32 %s1681_s16, %s1399_s17  ;;  %p2714_p10 = por %p2713_p9, %p2712_p8 }
  0x63   :  { %2187 = vmatpush1.bf16.msra.mxu0 %v2838_v31 }
  0x64   :  { %2189 = vmatprep.subr.bf16.mxu0 %v2841_v33  ;;  %2212 = vmatpush3.bf16.msra.mxu1 %v2854_v46  ;;  %p2715_p11 = pnand %p2714_p10, %p2708_p7 }
  0x65   :  { %2213 = vmatprep.subr.bf16.mxu1 %v2742_v0 }
  0x67   :  { %2191 = vmatpush1.bf16.msra.mxu0 %v2848_v41 }
  0x68   :  { %2193 = vmatprep.subr.bf16.mxu0 %v2851_v42  ;;  %2215 = vmatpush3.bf16.msra.mxu1 %v2864_v55 }
  0x69   :  { %2216 = vmatprep.subr.bf16.mxu1 %v2742_v0 }
  0x6b   :  { %2195 = vmatpush1.bf16.msra.mxu0 %v2858_v50 }
  0x6c   :  { %2197 = vmatprep.subr.bf16.mxu0 %v2861_v51  ;;  %2218 = vmatpush3.bf16.msra.mxu1 %v2874_v63 }
  0x6d   :  { %2219 = vmatprep.subr.bf16.mxu1 %v2742_v0 }
  0x6f   :  { %2199 = vmatpush1.bf16.msra.mxu0 %v2868_v59 }
  0x70   :  { %2201 = vmatprep.subr.bf16.mxu0 %v2871_v60  ;;  %2221 = vmatpush3.bf16.msra.mxu1 %v2882_v6 }
  0x71   :  { %2222 = vmatprep.subr.bf16.mxu1 %v2742_v0 }
  0x73   :  { %2203 = vmatpush1.bf16.msra.mxu0 %v2878_v4 }
  0x74   :  { %2229 = vmatprep.subr.bf16.mxu0 %v2816_v5  ;;  %2224 = vmatpush3.bf16.msra.mxu1 %v2892_v12 }
  0x75   :  { %2225 = vmatprep.subr.bf16.mxu1 %v2742_v0 }
  0x78   :  { %2227 = vmatpush3.bf16.msra.mxu1 %v2900_v17 }
  0x79   :  { %2260 = vmatprep.subr.bf16.mxu1 %v2742_v0 }
 0x129   :  { %v197_v28 = vpop.f32.mrb[0].mxu0 }
 0x12a   :  { %v198_v30 = vadd.f32 %v197_v28, %v2942_v25  ;;  %v199_v32 = vpop.f32.mrb[1].mxu0 }
 0x12b   :  { %v200_v34 = vadd.f32 %v199_v32, %v2944_v26 }
 0x12c   :  { %v272_v36 = vadd.f32 %v198_v30, %v114_v27 }
 0x12d   :  { %v282_v39 = vadd.f32 %v280_v35, %v200_v34 }
 0x12e   :  { %v1619_v38 = vmul.f32 -1.442695, %v272_v36  ;;  %v268_v40 = vpop.f32.mrb[0].mxu1 }
 0x12f   :  { %v1620_v43 = vmul.f32 -1.442695, %v282_v39  ;;  %v1870_v44 = vpop.f32.mrb[1].mxu1  ;;  %v269_v54 = vadd.f32 %v268_v40, %v2948_v49 }
 0x130   :  { %2573 = vpow2.f32 %v1619_v38 }
 0x131   :  { %2575 = vpow2.f32 %v1620_v43 }
 0x13a   :  { %v2574_v45 = vpop.eup %2573 }
 0x13b   :  { %v276_v47 = vadd.f32 1.0, %v2574_v45  ;;  %v2576_v52 = vpop.eup %2575 }
 0x13c   :  { %v286_v53 = vadd.f32 1.0, %v2576_v52 }
 0x13d   :  { %2577 = vrcp.f32 %v276_v47 }
 0x13e   :  { %2579 = vrcp.f32 %v286_v53 }
 0x147   :  { %v2578_v57 = vpop.eup %2577 }
 0x148   :  { %v289_v58 = vmul.f32 %v2578_v57, %v269_v54  ;;  %v2580_v62 = vpop.eup %2579 }
 0x149   :  { %v294_v2 = vsub.f32 1.0, %v2580_v62  ;;  %v296_v8 = vmul.f32 %v2580_v62, %v2889_v11  ;;  %v312_v11 = vld [vmem:[%s311_s13] ss:$8 sm:$0x7]  ;;  %s1221_s13 = scalar_lea.vmem [#allocation4], %s1220_s12 }
 0x14a   :  { %v292_v61 = vadd.f32 %v290_v56, %v289_v58  ;;  %v462_v27 = vrot.slane %v312_v11, 1  ;;  %v472_v43 = vrot.slane %v312_v11, 2  ;;  %v494_v58 = vld [vmem:[%s493_s19] ss:$8 sm:$0x7]  ;;  %s1403_s19 = scalar_lea.vmem [#allocation4], %s1402_s18 }
 0x14c   :  { %2581 = vtanh.f32 %v292_v61 }
 0x156   :  { %v2582_v3 = vpop.eup %2581 }
 0x157   :  { %v295_v7 = vmul.f32 %v2582_v3, %v294_v2 }
 0x159   :  { %v2952_v13 = vadd.f32 %v296_v8, %v295_v7 }
 0x15b   :  { %298 = vst [vmem:[#allocation9] sm:$0x1] %v2952_v13  ;;  %378 = vmatmul.mubr.f32.vlgmr.msra.gmra.mrb[2].mxu0 %v2952_v13  ;;  %1904 = vmatmul.mubr.f32.vlgmr.msra.gmra.mrb[2].mxu1 %v2952_v13 }
 0x15c   :  { %2231 = vmatpush1.bf16.msra.mxu0 %v2818_v9  ;;  %2262 = vmatpush3.bf16.msra.mxu1 %v2835_v29 }
 0x15d   :  { %2233 = vmatprep.subr.bf16.mxu0 %v2820_v10  ;;  %2263 = vmatprep.subr.bf16.mxu1 %v2742_v0 }
 0x15e   :  { %559 = vmatprep.mubr.f32.mxu0 %v2743_v1  ;;  %1938 = vmatprep.mubr.msk.f32.mxu1 %vm2744_vm0, %v2743_v1 }
 0x160   :  { %2235 = vmatpush1.bf16.msra.mxu0 %v2824_v15  ;;  %2265 = vmatpush3.bf16.msra.mxu1 %v2844_v37 }
 0x161   :  { %2237 = vmatprep.subr.bf16.mxu0 %v2827_v16  ;;  %2266 = vmatprep.subr.bf16.mxu1 %v2742_v0 }
 0x164   :  { %2239 = vmatpush1.bf16.msra.mxu0 %v2830_v21  ;;  %2268 = vmatpush3.bf16.msra.mxu1 %v2854_v46 }
 0x165   :  { %2241 = vmatprep.subr.bf16.mxu0 %v2833_v22  ;;  %2269 = vmatprep.subr.bf16.mxu1 %v2742_v0 }
 0x168   :  { %2243 = vmatpush1.bf16.msra.mxu0 %v2838_v31  ;;  %2271 = vmatpush3.bf16.msra.mxu1 %v2864_v55 }
 0x169   :  { %2245 = vmatprep.subr.bf16.mxu0 %v2841_v33  ;;  %2272 = vmatprep.subr.bf16.mxu1 %v2742_v0 }
 0x16c   :  { %2247 = vmatpush1.bf16.msra.mxu0 %v2848_v41  ;;  %2274 = vmatpush3.bf16.msra.mxu1 %v2874_v63 }
 0x16d   :  { %2249 = vmatprep.subr.bf16.mxu0 %v2851_v42  ;;  %2275 = vmatprep.subr.bf16.mxu1 %v2742_v0 }
 0x170   :  { %2251 = vmatpush1.bf16.msra.mxu0 %v2858_v50  ;;  %2277 = vmatpush3.bf16.msra.mxu1 %v2882_v6 }
 0x171   :  { %2253 = vmatprep.subr.bf16.mxu0 %v2861_v51  ;;  %2278 = vmatprep.subr.bf16.mxu1 %v2742_v0 }
 0x174   :  { %2255 = vmatpush1.bf16.msra.mxu0 %v2868_v59  ;;  %2280 = vmatpush3.bf16.msra.mxu1 %v2892_v12 }
 0x175   :  { %2257 = vmatprep.subr.bf16.mxu0 %v2871_v60  ;;  %2281 = vmatprep.subr.bf16.mxu1 %v2742_v0 }
 0x178   :  { %2259 = vmatpush1.bf16.msra.mxu0 %v2878_v4  ;;  %2283 = vmatpush3.bf16.msra.mxu1 %v2900_v17 }
 0x179   :  { %2285 = vmatprep.subr.bf16.mxu0 %v2816_v5  ;;  %2316 = vmatprep.subr.bf16.mxu1 %v2742_v0 }
 0x22e   :  { %v379_v14 = vpop.f32.mrb[2].mxu0  ;;  %v450_v18 = vpop.f32.mrb[2].mxu1 }
 0x22f   :  { %v380_v19 = vadd.f32 %v379_v14, %v2942_v25  ;;  %v381_v20 = vpop.f32.mrb[3].mxu0  ;;  %v1905_v23 = vpop.f32.mrb[3].mxu1  ;;  %v451_v40 = vadd.f32 %v450_v18, %v2948_v49 }
 0x230   :  { %v382_v24 = vadd.f32 %v381_v20, %v2944_v26 }
 0x231   :  { %v454_v28 = vadd.f32 %v380_v19, %v312_v11 }
 0x232   :  { %v464_v32 = vadd.f32 %v462_v27, %v382_v24 }
 0x233   :  { %v1628_v30 = vmul.f32 -1.442695, %v454_v28 }
 0x234   :  { %v1629_v34 = vmul.f32 -1.442695, %v464_v32 }
 0x235   :  { %2583 = vpow2.f32 %v1628_v30  ;;  %v654_v30 = vrot.slane %v494_v58, 2 }
 0x236   :  { %2585 = vpow2.f32 %v1629_v34 }
 0x23f   :  { %v2584_v35 = vpop.eup %2583 }
 0x240   :  { %v458_v36 = vadd.f32 1.0, %v2584_v35  ;;  %v2586_v38 = vpop.eup %2585 }
 0x241   :  { %v468_v39 = vadd.f32 1.0, %v2586_v38 }
 0x242   :  { %2587 = vrcp.f32 %v458_v36 }
 0x243   :  { %2589 = vrcp.f32 %v468_v39 }
 0x24c   :  { %v2588_v44 = vpop.eup %2587 }
 0x24d   :  { %v471_v45 = vmul.f32 %v2588_v44, %v451_v40  ;;  %v2590_v48 = vpop.eup %2589 }
 0x24e   :  { %v476_v52 = vsub.f32 1.0, %v2590_v48  ;;  %v478_v56 = vmul.f32 %v2590_v48, %v2952_v13  ;;  %v644_v13 = vrot.slane %v494_v58, 1 }
 0x24f   :  { %v474_v47 = vadd.f32 %v472_v43, %v471_v45  ;;  %v676_v45 = vld [vmem:[%s675_s25] ss:$8 sm:$0x7] }
 0x251   :  { %2591 = vtanh.f32 %v474_v47 }
 0x25b   :  { %v2592_v53 = vpop.eup %2591 }
 0x25c   :  { %v477_v54 = vmul.f32 %v2592_v53, %v476_v52 }
 0x25e   :  { %v2996_v57 = vadd.f32 %v478_v56, %v477_v54 }
 0x260   :  { %480 = vst [vmem:[#allocation9 + $0x1] sm:$0x1] %v2996_v57  ;;  %560 = vmatmul.mubr.f32.vlgmr.msra.gmra.mrb[4].mxu0 %v2996_v57  ;;  %1939 = vmatmul.mubr.f32.vlgmr.msra.gmra.mrb[4].mxu1 %v2996_v57 }
 0x261   :  { %2287 = vmatpush1.bf16.msra.mxu0 %v2818_v9  ;;  %2318 = vmatpush3.bf16.msra.mxu1 %v2835_v29 }
 0x262   :  { %2289 = vmatprep.subr.bf16.mxu0 %v2820_v10  ;;  %2319 = vmatprep.subr.bf16.mxu1 %v2742_v0 }
 0x263   :  { %741 = vmatprep.mubr.f32.mxu0 %v2743_v1  ;;  %1973 = vmatprep.mubr.msk.f32.mxu1 %vm2744_vm0, %v2743_v1 }
 0x265   :  { %2291 = vmatpush1.bf16.msra.mxu0 %v2824_v15  ;;  %2321 = vmatpush3.bf16.msra.mxu1 %v2844_v37 }
 0x266   :  { %2293 = vmatprep.subr.bf16.mxu0 %v2827_v16  ;;  %2322 = vmatprep.subr.bf16.mxu1 %v2742_v0 }
 0x269   :  { %2295 = vmatpush1.bf16.msra.mxu0 %v2830_v21  ;;  %2324 = vmatpush3.bf16.msra.mxu1 %v2854_v46 }
 0x26a   :  { %2297 = vmatprep.subr.bf16.mxu0 %v2833_v22  ;;  %2325 = vmatprep.subr.bf16.mxu1 %v2742_v0 }
 0x26d   :  { %2299 = vmatpush1.bf16.msra.mxu0 %v2838_v31  ;;  %2327 = vmatpush3.bf16.msra.mxu1 %v2864_v55 }
 0x26e   :  { %2301 = vmatprep.subr.bf16.mxu0 %v2841_v33  ;;  %2328 = vmatprep.subr.bf16.mxu1 %v2742_v0 }
 0x271   :  { %2303 = vmatpush1.bf16.msra.mxu0 %v2848_v41  ;;  %2330 = vmatpush3.bf16.msra.mxu1 %v2874_v63 }
 0x272   :  { %2305 = vmatprep.subr.bf16.mxu0 %v2851_v42  ;;  %2331 = vmatprep.subr.bf16.mxu1 %v2742_v0 }
 0x275   :  { %2307 = vmatpush1.bf16.msra.mxu0 %v2858_v50  ;;  %2333 = vmatpush3.bf16.msra.mxu1 %v2882_v6 }
 0x276   :  { %2309 = vmatprep.subr.bf16.mxu0 %v2861_v51  ;;  %2334 = vmatprep.subr.bf16.mxu1 %v2742_v0 }
 0x279   :  { %2311 = vmatpush1.bf16.msra.mxu0 %v2868_v59  ;;  %2336 = vmatpush3.bf16.msra.mxu1 %v2892_v12 }
 0x27a   :  { %2313 = vmatprep.subr.bf16.mxu0 %v2871_v60  ;;  %2337 = vmatprep.subr.bf16.mxu1 %v2742_v0 }
 0x27d   :  { %2315 = vmatpush1.bf16.msra.mxu0 %v2878_v4  ;;  %2339 = vmatpush3.bf16.msra.mxu1 %v2900_v17 }
 0x27e   :  { %2341 = vmatprep.subr.bf16.mxu0 %v2816_v5  ;;  %2372 = vmatprep.subr.bf16.mxu1 %v2742_v0 }
 0x333   :  { %v561_v61 = vpop.f32.mrb[4].mxu0  ;;  %v632_v62 = vpop.f32.mrb[4].mxu1 }
 0x334   :  { %v562_v2 = vadd.f32 %v561_v61, %v2942_v25  ;;  %v563_v3 = vpop.f32.mrb[5].mxu0  ;;  %v1940_v7 = vpop.f32.mrb[5].mxu1  ;;  %v633_v28 = vadd.f32 %v632_v62, %v2948_v49 }
 0x335   :  { %v564_v8 = vadd.f32 %v563_v3, %v2944_v26 }
 0x336   :  { %v636_v11 = vadd.f32 %v562_v2, %v494_v58 }
 0x337   :  { %v646_v18 = vadd.f32 %v644_v13, %v564_v8 }
 0x338   :  { %v1637_v14 = vmul.f32 -1.442695, %v636_v11 }
 0x339   :  { %v1638_v19 = vmul.f32 -1.442695, %v646_v18 }
 0x33a   :  { %2593 = vpow2.f32 %v1637_v14  ;;  %v836_v14 = vrot.slane %v676_v45, 2 }
 0x33b   :  { %2595 = vpow2.f32 %v1638_v19 }
 0x344   :  { %v2594_v20 = vpop.eup %2593 }
 0x345   :  { %v640_v23 = vadd.f32 1.0, %v2594_v20  ;;  %v2596_v24 = vpop.eup %2595 }
 0x346   :  { %v650_v27 = vadd.f32 1.0, %v2596_v24 }
 0x347   :  { %2597 = vrcp.f32 %v640_v23 }
 0x348   :  { %2599 = vrcp.f32 %v650_v27 }
 0x351   :  { %v2598_v32 = vpop.eup %2597 }
 0x352   :  { %v653_v34 = vmul.f32 %v2598_v32, %v633_v28  ;;  %v2600_v36 = vpop.eup %2599 }
 0x353   :  { %v658_v38 = vsub.f32 1.0, %v2600_v36  ;;  %v660_v43 = vmul.f32 %v2600_v36, %v2996_v57  ;;  %v826_v57 = vrot.slane %v676_v45, 1 }
 0x354   :  { %v656_v35 = vadd.f32 %v654_v30, %v653_v34  ;;  %v858_v34 = vld [vmem:[%s857_s28] ss:$8 sm:$0x7] }
 0x356   :  { %2601 = vtanh.f32 %v656_v35 }
 0x360   :  { %v2602_v39 = vpop.eup %2601 }
 0x361   :  { %v659_v40 = vmul.f32 %v2602_v39, %v658_v38 }
 0x363   :  { %v3040_v44 = vadd.f32 %v660_v43, %v659_v40 }
 0x365   :  { %662 = vst [vmem:[#allocation9 + $0x2] sm:$0x1] %v3040_v44  ;;  %742 = vmatmul.mubr.f32.vlgmr.msra.gmra.mrb[6].mxu0 %v3040_v44  ;;  %1974 = vmatmul.mubr.f32.vlgmr.msra.gmra.mrb[6].mxu1 %v3040_v44 }
 0x366   :  { %2343 = vmatpush1.bf16.msra.mxu0 %v2818_v9  ;;  %2374 = vmatpush3.bf16.msra.mxu1 %v2835_v29 }
 0x367   :  { %2345 = vmatprep.subr.bf16.mxu0 %v2820_v10  ;;  %2375 = vmatprep.subr.bf16.mxu1 %v2742_v0 }
 0x368   :  { %923 = vmatprep.mubr.f32.mxu0 %v2743_v1  ;;  %2008 = vmatprep.mubr.msk.f32.mxu1 %vm2744_vm0, %v2743_v1 }
 0x36a   :  { %2347 = vmatpush1.bf16.msra.mxu0 %v2824_v15  ;;  %2377 = vmatpush3.bf16.msra.mxu1 %v2844_v37 }
 0x36b   :  { %2349 = vmatprep.subr.bf16.mxu0 %v2827_v16  ;;  %2378 = vmatprep.subr.bf16.mxu1 %v2742_v0 }
 0x36e   :  { %2351 = vmatpush1.bf16.msra.mxu0 %v2830_v21  ;;  %2380 = vmatpush3.bf16.msra.mxu1 %v2854_v46 }
 0x36f   :  { %2353 = vmatprep.subr.bf16.mxu0 %v2833_v22  ;;  %2381 = vmatprep.subr.bf16.mxu1 %v2742_v0 }
 0x372   :  { %2355 = vmatpush1.bf16.msra.mxu0 %v2838_v31  ;;  %2383 = vmatpush3.bf16.msra.mxu1 %v2864_v55 }
 0x373   :  { %2357 = vmatprep.subr.bf16.mxu0 %v2841_v33  ;;  %2384 = vmatprep.subr.bf16.mxu1 %v2742_v0 }
 0x376   :  { %2359 = vmatpush1.bf16.msra.mxu0 %v2848_v41  ;;  %2386 = vmatpush3.bf16.msra.mxu1 %v2874_v63 }
 0x377   :  { %2361 = vmatprep.subr.bf16.mxu0 %v2851_v42  ;;  %2387 = vmatprep.subr.bf16.mxu1 %v2742_v0 }
 0x37a   :  { %2363 = vmatpush1.bf16.msra.mxu0 %v2858_v50  ;;  %2389 = vmatpush3.bf16.msra.mxu1 %v2882_v6 }
 0x37b   :  { %2365 = vmatprep.subr.bf16.mxu0 %v2861_v51  ;;  %2390 = vmatprep.subr.bf16.mxu1 %v2742_v0 }
 0x37e   :  { %2367 = vmatpush1.bf16.msra.mxu0 %v2868_v59  ;;  %2392 = vmatpush3.bf16.msra.mxu1 %v2892_v12 }
 0x37f   :  { %2369 = vmatprep.subr.bf16.mxu0 %v2871_v60  ;;  %2393 = vmatprep.subr.bf16.mxu1 %v2742_v0 }
 0x382   :  { %2371 = vmatpush1.bf16.msra.mxu0 %v2878_v4  ;;  %2395 = vmatpush3.bf16.msra.mxu1 %v2900_v17 }
 0x383   :  { %2397 = vmatprep.subr.bf16.mxu0 %v2816_v5  ;;  %2428 = vmatprep.subr.bf16.mxu1 %v2742_v0 }
 0x438   :  { %v743_v47 = vpop.f32.mrb[6].mxu0  ;;  %v814_v48 = vpop.f32.mrb[6].mxu1 }
 0x439   :  { %v744_v52 = vadd.f32 %v743_v47, %v2942_v25  ;;  %v745_v53 = vpop.f32.mrb[7].mxu0  ;;  %v1975_v54 = vpop.f32.mrb[7].mxu1  ;;  %v815_v11 = vadd.f32 %v814_v48, %v2948_v49 }
 0x43a   :  { %v746_v56 = vadd.f32 %v745_v53, %v2944_v26 }
 0x43b   :  { %v818_v58 = vadd.f32 %v744_v52, %v676_v45 }
 0x43c   :  { %v828_v62 = vadd.f32 %v826_v57, %v746_v56 }
 0x43d   :  { %v1646_v61 = vmul.f32 -1.442695, %v818_v58 }
 0x43e   :  { %v1647_v2 = vmul.f32 -1.442695, %v828_v62 }
 0x43f   :  { %2603 = vpow2.f32 %v1646_v61  ;;  %v1018_v61 = vrot.slane %v858_v34, 2 }
 0x440   :  { %2605 = vpow2.f32 %v1647_v2 }
 0x449   :  { %v2604_v3 = vpop.eup %2603 }
 0x44a   :  { %v822_v7 = vadd.f32 1.0, %v2604_v3  ;;  %v2606_v8 = vpop.eup %2605 }
 0x44b   :  { %v832_v13 = vadd.f32 1.0, %v2606_v8 }
 0x44c   :  { %2607 = vrcp.f32 %v822_v7 }
 0x44d   :  { %2609 = vrcp.f32 %v832_v13 }
 0x456   :  { %v2608_v18 = vpop.eup %2607 }
 0x457   :  { %v835_v19 = vmul.f32 %v2608_v18, %v815_v11  ;;  %v2610_v23 = vpop.eup %2609 }
 0x458   :  { %v840_v24 = vsub.f32 1.0, %v2610_v23  ;;  %v842_v30 = vmul.f32 %v2610_v23, %v3040_v44  ;;  %v1008_v44 = vrot.slane %v858_v34, 1 }
 0x459   :  { %v838_v20 = vadd.f32 %v836_v14, %v835_v19  ;;  %v1040_v19 = vld [vmem:[%s1039_s9] ss:$8 sm:$0x7] }
 0x45b   :  { %2611 = vtanh.f32 %v838_v20 }
 0x465   :  { %v2612_v27 = vpop.eup %2611 }
 0x466   :  { %v841_v28 = vmul.f32 %v2612_v27, %v840_v24 }
 0x468   :  { %v3084_v32 = vadd.f32 %v842_v30, %v841_v28  ;;  %v1190_v30 = vrot.slane %v1040_v19, 1 }
 0x46a   :  { %844 = vst [vmem:[#allocation9 + $0x3] sm:$0x1] %v3084_v32  ;;  %924 = vmatmul.mubr.f32.vlgmr.msra.gmra.mrb[8].mxu0 %v3084_v32  ;;  %2009 = vmatmul.mubr.f32.vlgmr.msra.gmra.mrb[8].mxu1 %v3084_v32 }
 0x46b   :  { %2399 = vmatpush1.bf16.msra.mxu0 %v2818_v9  ;;  %2430 = vmatpush3.bf16.msra.mxu1 %v2835_v29 }
 0x46c   :  { %2401 = vmatprep.subr.bf16.mxu0 %v2820_v10  ;;  %2431 = vmatprep.subr.bf16.mxu1 %v2742_v0 }
 0x46d   :  { %1105 = vmatprep.mubr.f32.mxu0 %v2743_v1  ;;  %2043 = vmatprep.mubr.msk.f32.mxu1 %vm2744_vm0, %v2743_v1 }
 0x46f   :  { %2403 = vmatpush1.bf16.msra.mxu0 %v2824_v15  ;;  %2433 = vmatpush3.bf16.msra.mxu1 %v2844_v37 }
 0x470   :  { %2405 = vmatprep.subr.bf16.mxu0 %v2827_v16  ;;  %2434 = vmatprep.subr.bf16.mxu1 %v2742_v0 }
 0x473   :  { %2407 = vmatpush1.bf16.msra.mxu0 %v2830_v21  ;;  %2436 = vmatpush3.bf16.msra.mxu1 %v2854_v46 }
 0x474   :  { %2409 = vmatprep.subr.bf16.mxu0 %v2833_v22  ;;  %2437 = vmatprep.subr.bf16.mxu1 %v2742_v0 }
 0x477   :  { %2411 = vmatpush1.bf16.msra.mxu0 %v2838_v31  ;;  %2439 = vmatpush3.bf16.msra.mxu1 %v2864_v55 }
 0x478   :  { %2413 = vmatprep.subr.bf16.mxu0 %v2841_v33  ;;  %2440 = vmatprep.subr.bf16.mxu1 %v2742_v0 }
 0x47b   :  { %2415 = vmatpush1.bf16.msra.mxu0 %v2848_v41  ;;  %2442 = vmatpush3.bf16.msra.mxu1 %v2874_v63 }
 0x47c   :  { %2417 = vmatprep.subr.bf16.mxu0 %v2851_v42  ;;  %2443 = vmatprep.subr.bf16.mxu1 %v2742_v0 }
 0x47f   :  { %2419 = vmatpush1.bf16.msra.mxu0 %v2858_v50  ;;  %2445 = vmatpush3.bf16.msra.mxu1 %v2882_v6 }
 0x480   :  { %2421 = vmatprep.subr.bf16.mxu0 %v2861_v51  ;;  %2446 = vmatprep.subr.bf16.mxu1 %v2742_v0 }
 0x483   :  { %2423 = vmatpush1.bf16.msra.mxu0 %v2868_v59  ;;  %2448 = vmatpush3.bf16.msra.mxu1 %v2892_v12 }
 0x484   :  { %2425 = vmatprep.subr.bf16.mxu0 %v2871_v60  ;;  %2449 = vmatprep.subr.bf16.mxu1 %v2742_v0 }
 0x487   :  { %2427 = vmatpush1.bf16.msra.mxu0 %v2878_v4  ;;  %2451 = vmatpush3.bf16.msra.mxu1 %v2900_v17 }
 0x488   :  { %2453 = vmatprep.subr.bf16.mxu0 %v2816_v5  ;;  %2484 = vmatprep.subr.bf16.mxu1 %v2742_v0 }
 0x53d   :  { %v925_v35 = vpop.f32.mrb[8].mxu0  ;;  %v996_v36 = vpop.f32.mrb[8].mxu1 }
 0x53e   :  { %v926_v38 = vadd.f32 %v925_v35, %v2942_v25  ;;  %v927_v39 = vpop.f32.mrb[9].mxu0  ;;  %v2010_v40 = vpop.f32.mrb[9].mxu1  ;;  %v997_v58 = vadd.f32 %v996_v36, %v2948_v49 }
 0x53f   :  { %v928_v43 = vadd.f32 %v927_v39, %v2944_v26 }
 0x540   :  { %v1000_v45 = vadd.f32 %v926_v38, %v858_v34 }
 0x541   :  { %v1010_v48 = vadd.f32 %v1008_v44, %v928_v43 }
 0x542   :  { %v1655_v47 = vmul.f32 -1.442695, %v1000_v45  ;;  %v1200_v45 = vrot.slane %v1040_v19, 2 }
 0x543   :  { %v1656_v52 = vmul.f32 -1.442695, %v1010_v48 }
 0x544   :  { %2613 = vpow2.f32 %v1655_v47 }
 0x545   :  { %2615 = vpow2.f32 %v1656_v52 }
 0x54e   :  { %v2614_v53 = vpop.eup %2613 }
 0x54f   :  { %v1004_v54 = vadd.f32 1.0, %v2614_v53  ;;  %v2616_v56 = vpop.eup %2615 }
 0x550   :  { %v1014_v57 = vadd.f32 1.0, %v2616_v56 }
 0x551   :  { %2617 = vrcp.f32 %v1004_v54 }
 0x552   :  { %2619 = vrcp.f32 %v1014_v57 }
 0x55b   :  { %v2618_v62 = vpop.eup %2617 }
 0x55c   :  { %v1017_v2 = vmul.f32 %v2618_v62, %v997_v58  ;;  %v2620_v7 = vpop.eup %2619 }
 0x55d   :  { %v1022_v8 = vsub.f32 1.0, %v2620_v7  ;;  %v1024_v14 = vmul.f32 %v2620_v7, %v3084_v32 }
 0x55e   :  { %v1020_v3 = vadd.f32 %v1018_v61, %v1017_v2 }
 0x560   :  { %2621 = vtanh.f32 %v1020_v3  ;;  %v1404_v3 = vld [vmem:[%s1403_s19] ss:$8 sm:$0x7] }
 0x56a   :  { %v2622_v13 = vpop.eup %2621 }
 0x56b   :  { %v1023_v11 = vmul.f32 %v2622_v13, %v1022_v8 }
 0x56d   :  { %v3128_v18 = vadd.f32 %v1024_v14, %v1023_v11 }
 0x56f   :  { %1026 = vst [vmem:[#allocation9 + $0x4] sm:$0x1] %v3128_v18  ;;  %1106 = vmatmul.mubr.f32.vlgmr.msra.gmra.mrb[10].mxu0 %v3128_v18  ;;  %2044 = vmatmul.mubr.f32.vlgmr.msra.gmra.mrb[10].mxu1 %v3128_v18 }
 0x570   :  { %2455 = vmatpush1.bf16.msra.mxu0 %v2818_v9  ;;  %2486 = vmatpush3.bf16.msra.mxu1 %v2835_v29 }
 0x571   :  { %2457 = vmatprep.subr.bf16.mxu0 %v2820_v10  ;;  %2487 = vmatprep.subr.bf16.mxu1 %v2742_v0 }
 0x572   :  { %1287 = vmatprep.mubr.f32.mxu0 %v2743_v1  ;;  %2078 = vmatprep.mubr.msk.f32.mxu1 %vm2744_vm0, %v2743_v1 }
 0x574   :  { %2459 = vmatpush1.bf16.msra.mxu0 %v2824_v15  ;;  %2489 = vmatpush3.bf16.msra.mxu1 %v2844_v37 }
 0x575   :  { %2461 = vmatprep.subr.bf16.mxu0 %v2827_v16  ;;  %2490 = vmatprep.subr.bf16.mxu1 %v2742_v0 }
 0x578   :  { %2463 = vmatpush1.bf16.msra.mxu0 %v2830_v21  ;;  %2492 = vmatpush3.bf16.msra.mxu1 %v2854_v46 }
 0x579   :  { %2465 = vmatprep.subr.bf16.mxu0 %v2833_v22  ;;  %2493 = vmatprep.subr.bf16.mxu1 %v2742_v0 }
 0x57c   :  { %2467 = vmatpush1.bf16.msra.mxu0 %v2838_v31  ;;  %2495 = vmatpush3.bf16.msra.mxu1 %v2864_v55 }
 0x57d   :  { %2469 = vmatprep.subr.bf16.mxu0 %v2841_v33  ;;  %2496 = vmatprep.subr.bf16.mxu1 %v2742_v0 }
 0x580   :  { %2471 = vmatpush1.bf16.msra.mxu0 %v2848_v41  ;;  %2498 = vmatpush3.bf16.msra.mxu1 %v2874_v63 }
 0x581   :  { %2473 = vmatprep.subr.bf16.mxu0 %v2851_v42  ;;  %2499 = vmatprep.subr.bf16.mxu1 %v2742_v0 }
 0x584   :  { %2475 = vmatpush1.bf16.msra.mxu0 %v2858_v50  ;;  %2501 = vmatpush3.bf16.msra.mxu1 %v2882_v6 }
 0x585   :  { %2477 = vmatprep.subr.bf16.mxu0 %v2861_v51  ;;  %2502 = vmatprep.subr.bf16.mxu1 %v2742_v0 }
 0x588   :  { %2479 = vmatpush1.bf16.msra.mxu0 %v2868_v59  ;;  %2504 = vmatpush3.bf16.msra.mxu1 %v2892_v12 }
 0x589   :  { %2481 = vmatprep.subr.bf16.mxu0 %v2871_v60  ;;  %2505 = vmatprep.subr.bf16.mxu1 %v2742_v0 }
 0x58c   :  { %2483 = vmatpush1.bf16.msra.mxu0 %v2878_v4  ;;  %2507 = vmatpush3.bf16.msra.mxu1 %v2900_v17 }
 0x58d   :  { %2509 = vmatprep.subr.bf16.mxu0 %v2816_v5  ;;  %2540 = vmatprep.subr.bf16.mxu1 %v2742_v0 }
 0x642   :  { %v1107_v20 = vpop.f32.mrb[10].mxu0  ;;  %v1178_v23 = vpop.f32.mrb[10].mxu1 }
 0x643   :  { %v1108_v24 = vadd.f32 %v1107_v20, %v2942_v25  ;;  %v1109_v27 = vpop.f32.mrb[11].mxu0  ;;  %v2045_v28 = vpop.f32.mrb[11].mxu1  ;;  %v1179_v44 = vadd.f32 %v1178_v23, %v2948_v49 }
 0x644   :  { %v1110_v5 = vadd.f32 %v1109_v27, %v2944_v26 }
 0x645   :  { %v1182_v32 = vadd.f32 %v1108_v24, %v1040_v19  ;;  %v1554_v19 = vrot.slane %v1404_v3, 1 }
 0x646   :  { %v1192_v35 = vadd.f32 %v1190_v30, %v1110_v5 }
 0x647   :  { %v1664_v34 = vmul.f32 -1.442695, %v1182_v32 }
 0x648   :  { %v1665_v36 = vmul.f32 -1.442695, %v1192_v35  ;;  %v1564_v35 = vrot.slane %v1404_v3, 2 }
 0x649   :  { %2623 = vpow2.f32 %v1664_v34 }
 0x64a   :  { %2625 = vpow2.f32 %v1665_v36 }
 0x653   :  { %v2624_v38 = vpop.eup %2623 }
 0x654   :  { %v1186_v39 = vadd.f32 1.0, %v2624_v38  ;;  %v2626_v40 = vpop.eup %2625 }
 0x655   :  { %v1196_v43 = vadd.f32 1.0, %v2626_v40 }
 0x656   :  { %2627 = vrcp.f32 %v1186_v39 }
 0x657   :  { %2629 = vrcp.f32 %v1196_v43 }
 0x660   :  { %v2628_v47 = vpop.eup %2627 }
 0x661   :  { %v1199_v48 = vmul.f32 %v2628_v47, %v1179_v44  ;;  %v2630_v53 = vpop.eup %2629 }
 0x662   :  { %v1204_v54 = vsub.f32 1.0, %v2630_v53  ;;  %v1206_v58 = vmul.f32 %v2630_v53, %v3128_v18 }
 0x663   :  { %v1202_v52 = vadd.f32 %v1200_v45, %v1199_v48 }
 0x665   :  { %2631 = vtanh.f32 %v1202_v52 }
 0x66f   :  { %v2632_v56 = vpop.eup %2631 }
 0x670   :  { %v1205_v57 = vmul.f32 %v2632_v56, %v1204_v54 }
 0x672   :  { %v3172_v61 = vadd.f32 %v1206_v58, %v1205_v57 }
 0x674   :  { %1208 = vst [vmem:[#allocation9 + $0x5] sm:$0x1] %v3172_v61  ;;  %1288 = vmatmul.mubr.f32.vlgmr.msra.gmra.mrb[12].mxu0 %v3172_v61  ;;  %2079 = vmatmul.mubr.f32.vlgmr.msra.gmra.mrb[12].mxu1 %v3172_v61 }
 0x675   :  { %2511 = vmatpush1.bf16.msra.mxu0 %v2818_v9  ;;  %2542 = vmatpush3.bf16.msra.mxu1 %v2835_v29 }
 0x676   :  { %2513 = vmatprep.subr.bf16.mxu0 %v2820_v10  ;;  %2543 = vmatprep.subr.bf16.mxu1 %v2742_v0 }
 0x677   :  { %1469 = vmatprep.mubr.f32.mxu0 %v2743_v1  ;;  %2113 = vmatprep.mubr.msk.f32.mxu1 %vm2744_vm0, %v2743_v1  ;;  %v1222_v1 = vld [vmem:[%s1221_s13] ss:$8 sm:$0x7] }
 0x679   :  { %2515 = vmatpush1.bf16.msra.mxu0 %v2824_v15  ;;  %2545 = vmatpush3.bf16.msra.mxu1 %v2844_v37 }
 0x67a   :  { %2517 = vmatprep.subr.bf16.mxu0 %v2827_v16  ;;  %2546 = vmatprep.subr.bf16.mxu1 %v2742_v0 }
 0x67d   :  { %2519 = vmatpush1.bf16.msra.mxu0 %v2830_v21  ;;  %2548 = vmatpush3.bf16.msra.mxu1 %v2854_v46 }
 0x67e   :  { %2521 = vmatprep.subr.bf16.mxu0 %v2833_v22  ;;  %2549 = vmatprep.subr.bf16.mxu1 %v2742_v0  ;;  %v1372_v22 = vrot.slane %v1222_v1, 1 }
 0x681   :  { %2523 = vmatpush1.bf16.msra.mxu0 %v2838_v31  ;;  %2551 = vmatpush3.bf16.msra.mxu1 %v2864_v55  ;;  %v1382_v55 = vrot.slane %v1222_v1, 2 }
 0x682   :  { %2525 = vmatprep.subr.bf16.mxu0 %v2841_v33  ;;  %2552 = vmatprep.subr.bf16.mxu1 %v2742_v0 }
 0x685   :  { %2527 = vmatpush1.bf16.msra.mxu0 %v2848_v41  ;;  %2554 = vmatpush3.bf16.msra.mxu1 %v2874_v63 }
 0x686   :  { %2529 = vmatprep.subr.bf16.mxu0 %v2851_v42  ;;  %2555 = vmatprep.subr.bf16.mxu1 %v2742_v0 }
 0x689   :  { %2531 = vmatpush1.bf16.msra.mxu0 %v2858_v50  ;;  %2557 = vmatpush3.bf16.msra.mxu1 %v2882_v6 }
 0x68a   :  { %2533 = vmatprep.subr.bf16.mxu0 %v2861_v51  ;;  %2558 = vmatprep.subr.bf16.mxu1 %v2742_v0 }
 0x68d   :  { %2535 = vmatpush1.bf16.msra.mxu0 %v2868_v59  ;;  %2560 = vmatpush3.bf16.msra.mxu1 %v2892_v12 }
 0x68e   :  { %2537 = vmatprep.subr.bf16.mxu0 %v2871_v60  ;;  %2561 = vmatprep.subr.bf16.mxu1 %v2742_v0 }
 0x691   :  { %2539 = vmatpush1.bf16.msra.mxu0 %v2878_v4  ;;  %2563 = vmatpush3.bf16.msra.mxu1 %v2900_v17 }
 0x747   :  { %v1289_v9 = vpop.f32.mrb[12].mxu0  ;;  %v1360_v10 = vpop.f32.mrb[12].mxu1 }
 0x748   :  { %v1290_v15 = vadd.f32 %v1289_v9, %v2942_v25  ;;  %v1291_v0 = vpop.f32.mrb[13].mxu0  ;;  %v2080_v16 = vpop.f32.mrb[13].mxu1  ;;  %v1361_v51 = vadd.f32 %v1360_v10, %v2948_v49 }
 0x749   :  { %v1292_v21 = vadd.f32 %v1291_v0, %v2944_v26 }
 0x74a   :  { %v1364_v29 = vadd.f32 %v1290_v15, %v1222_v1 }
 0x74b   :  { %v1374_v33 = vadd.f32 %v1372_v22, %v1292_v21 }
 0x74c   :  { %v1673_v31 = vmul.f32 -1.442695, %v1364_v29 }
 0x74d   :  { %v1674_v37 = vmul.f32 -1.442695, %v1374_v33 }
 0x74e   :  { %2633 = vpow2.f32 %v1673_v31 }
 0x74f   :  { %2635 = vpow2.f32 %v1674_v37 }
 0x758   :  { %v2634_v41 = vpop.eup %2633 }
 0x759   :  { %v1368_v42 = vadd.f32 1.0, %v2634_v41  ;;  %v2636_v46 = vpop.eup %2635 }
 0x75a   :  { %v1378_v50 = vadd.f32 1.0, %v2636_v46 }
 0x75b   :  { %2637 = vrcp.f32 %v1368_v42 }
 0x75c   :  { %2639 = vrcp.f32 %v1378_v50 }
 0x765   :  { %v2638_v59 = vpop.eup %2637 }
 0x766   :  { %v1381_v60 = vmul.f32 %v2638_v59, %v1361_v51  ;;  %v2640_v4 = vpop.eup %2639 }
 0x767   :  { %v1386_v6 = vsub.f32 1.0, %v2640_v4  ;;  %v1388_v62 = vmul.f32 %v2640_v4, %v3172_v61 }
 0x768   :  { %v1384_v63 = vadd.f32 %v1382_v55, %v1381_v60 }
 0x76a   :  { %2641 = vtanh.f32 %v1384_v63 }
 0x774   :  { %v2642_v12 = vpop.eup %2641 }
 0x775   :  { %v1387_v17 = vmul.f32 %v2642_v12, %v1386_v6 }
 0x777   :  { %v1389_v2 = vadd.f32 %v1388_v62, %v1387_v17 }
 0x779   :  { %1390 = vst [vmem:[#allocation9 + $0x6] sm:$0x1] %v1389_v2  ;;  %1470 = vmatmul.mubr.f32.vlgmr.msra.gmra.mrb[14].mxu0 %v1389_v2  ;;  %2114 = vmatmul.mubr.f32.vlgmr.msra.gmra.mrb[14].mxu1 %v1389_v2 }
 0x84c   :  { %v1471_v7 = vpop.f32.mrb[14].mxu0  ;;  %v1542_v8 = vpop.f32.mrb[14].mxu1 }
 0x84d   :  { %v1472_v13 = vadd.f32 %v1471_v7, %v2942_v25  ;;  %v1473_v11 = vpop.f32.mrb[15].mxu0  ;;  %v2115_v14 = vpop.f32.mrb[15].mxu1  ;;  %v1543_v34 = vadd.f32 %v1542_v8, %v2948_v49 }
 0x84e   :  { %v1474_v18 = vadd.f32 %v1473_v11, %v2944_v26 }
 0x84f   :  { %v1546_v20 = vadd.f32 %v1472_v13, %v1404_v3 }
 0x850   :  { %v1556_v24 = vadd.f32 %v1554_v19, %v1474_v18 }
 0x851   :  { %v1682_v23 = vmul.f32 -1.442695, %v1546_v20 }
 0x852   :  { %v1683_v27 = vmul.f32 -1.442695, %v1556_v24 }
 0x853   :  { %2643 = vpow2.f32 %v1682_v23 }
 0x854   :  { %2645 = vpow2.f32 %v1683_v27 }
 0x85d   :  { %v2644_v28 = vpop.eup %2643 }
 0x85e   :  { %v1550_v5 = vadd.f32 1.0, %v2644_v28  ;;  %v2646_v30 = vpop.eup %2645 }
 0x85f   :  { %v1560_v32 = vadd.f32 1.0, %v2646_v30 }
 0x860   :  { %2647 = vrcp.f32 %v1550_v5 }
 0x861   :  { %2649 = vrcp.f32 %v1560_v32 }
 0x86a   :  { %v2648_v25 = vpop.eup %2647 }
 0x86b   :  { %v1563_v36 = vmul.f32 %v2648_v25, %v1543_v34  ;;  %v2650_v26 = vpop.eup %2649 }
 0x86c   :  { %v1568_v39 = vsub.f32 1.0, %v2650_v26  ;;  %v1570_v44 = vmul.f32 %v2650_v26, %v1389_v2 }
 0x86d   :  { %v1566_v38 = vadd.f32 %v1564_v35, %v1563_v36 }
 0x86f   :  { %2651 = vtanh.f32 %v1566_v38 }
 0x879   :  { %v2652_v40 = vpop.eup %2651 }
 0x87a   :  { %v1569_v43 = vmul.f32 %v2652_v40, %v1568_v39 }
 0x87c   :  { %v1571_v45 = vadd.f32 %v1570_v44, %v1569_v43 }
 0x87e   :  { %1572 = vst [vmem:[#allocation9 + $0x7] sm:$0x1] %v1571_v45 }
 0x87f   :  { %2718 = shalt.err (!%p2715_p11)
}
 0x880   :  { %s2719_s25 = scalar_lea.hbm %s3234_s5, 128 }
 0x881   :  { %p2720_p12 = scmp.ne.s32.totalorder %s3234_s5, %s2719_s25  ;;  %p2723_p13 = scmp.lt.u32.totalorder %s2719_s25, %s3234_s5 }
 0x883   :  { %p2725_p0 = pnand %p2723_p13, %p2720_p12 }
 0x885   :  { %2728 = shalt.err (!%p2725_p0)
}
 0x886   :  { %1582 = dma.vmem_to_hbm [thread:$0]  %s1580_s21, 128, %s3234_s5, [#allocation6]  }
 0x887   :  { %2735 = dma.done.wait [#allocation6], 128  }
 0x888   :  { %2736 = vsyncadd [#allocation6], 4294967168 }
 0x889   :  { %1586 = vsyncpa [#allocation5], 1 }
 0x88a   :  { %1587 = vsyncpa [#allocation8], 1 }
 0x88b   :  { %1588 = vsyncpa [#allocation6], 1 }

</bundles_post_ra>
